<compile_context>
chip_gen: v7x
topology: tpu7x:2x2x1
jax: 0.10.0
libtpu: 0.0.40
codegen_flags: <defaults>
</compile_context>

<pallas_src>
import functools

import jax
import jax.numpy as jnp
from jax.experimental import pallas as pl
from jax.experimental.pallas import tpu as pltpu


# --------------------------------------------------------------------------
# Fused kernel
# --------------------------------------------------------------------------
def _bottleneck_fused_kernel(x_ref, w1_ref, b1_ref, w2_ref, b2_ref,
                             w3_ref, b3_ref, wse1_ref, bse1_ref,
                             wse2_ref, bse2_ref, o_ref, *, H, W):
    """x:(nb,HW,Cin) bf16 (also the identity, Cin==C4)  ->  o:(nb,HW,C4) f32."""
    nb, hw, cin = x_ref.shape
    width = w1_ref.shape[1]
    c4 = w3_ref.shape[1]
    bf = w1_ref.dtype

    x = x_ref[...]                                            # (nb, HW, Cin)

    # ---- stage 1: conv1 (1x1) + bn1 + relu --------------------------------
    y1 = jnp.dot(x.reshape(nb * hw, cin), w1_ref[...],
                 preferred_element_type=jnp.float32) + b1_ref[...]
    y1 = jnp.maximum(y1, 0.0).astype(bf).reshape(nb, H, W, width)

    # ---- stage 2: conv2 (3x3, stride=1, pad=1) + bn2 + relu ----------------
    # In-kernel zero padding (no host-side jnp.pad / HBM round-trip).
    zc = jnp.zeros((nb, H, 1, width), bf)
    zr = jnp.zeros((nb, 1, W + 2, width), bf)
    xp = jnp.concatenate(
        [zr, jnp.concatenate([zc, y1, zc], axis=2), zr], axis=1)  # (nb,H+2,W+2,w)
    # im2col along dx only -> K = 3*width; three matmuls (one per dy) instead
    # of nine K=width matmuls with nine full-block relayout copies.
    xcat = jnp.concatenate(
        [xp[:, :, 0:W, :], xp[:, :, 1:W + 1, :], xp[:, :, 2:W + 2, :]],
        axis=-1)                                              # (nb, H+2, W, 3w)
    acc = jnp.zeros((nb * H * W, width), jnp.float32)
    for dy in range(3):
        rows = xcat[:, dy:dy + H, :, :].reshape(nb * H * W, 3 * width)
        acc = acc + jnp.dot(rows, w2_ref[dy],
                            preferred_element_type=jnp.float32)
    y2 = jnp.maximum(acc + b2_ref[...], 0.0).astype(bf)       # (nb*HW, width)

    # ---- stage 3: conv3 (1x1) + bn3 ----------------------------------------
    t = jnp.dot(y2, w3_ref[...],
                preferred_element_type=jnp.float32) + b3_ref[...]
    t = t.reshape(nb, hw, c4)

    # ---- SE gate (row-vector, lane-dense) ----------------------------------
    xm = jnp.mean(t, axis=1)                                  # (nb, c4)
    g = jnp.dot(xm.astype(bf), wse1_ref[...],
                preferred_element_type=jnp.float32) + bse1_ref[...]
    g = jnp.maximum(g, 0.0)                                   # (nb, cr)
    s = jnp.dot(g.astype(bf), wse2_ref[...],
                preferred_element_type=jnp.float32) + bse2_ref[...]
    s = jax.nn.sigmoid(s)                                     # (nb, c4)

    # ---- SE scale + residual + final relu ----------------------------------
    out = t * s[:, None, :] + x.astype(jnp.float32)
    o_ref[...] = jnp.maximum(out, 0.0).astype(o_ref.dtype)


# --------------------------------------------------------------------------
# Wrapper helpers
# --------------------------------------------------------------------------
def _bn_fold(w, gamma, beta, mean, var, eps):
    """Fold inference-mode BatchNorm into a conv weight (out-channel major)."""
    inv = gamma / jnp.sqrt(var + eps)
    shape = (-1,) + (1,) * (w.ndim - 1)
    return w * inv.reshape(shape), beta - mean * inv


def _vmem_capacity_bytes():
    try:
        info = pltpu.get_tpu_info()
        cap = int(getattr(info, "vmem_capacity_bytes", 0)) or None
    except Exception:
        cap = None
    if cap is None:
        cap = 64 * 1024 * 1024          # conservative default (v7x per-TC VMEM)
    return cap


def _per_step_vmem_bytes(nb, H, W, cin, width, c4, cr):
    """Double-buffered streamed blocks + in-kernel live values (with slack)."""
    HW, bfb, f32 = H * W, 2, 4
    stream = 2 * nb * HW * cin * bfb + 2 * nb * HW * c4 * f32
    body = (nb * (H + 2) * (W + 2) * width * bfb       # padded stage-1 output
            + nb * (H + 2) * W * 3 * width * bfb       # dx-im2col
            + 2 * nb * HW * width * f32                # conv2 acc + relu copy
            + 2 * nb * HW * c4 * f32)                  # conv3 out + final value
    weights = 2 * ((cin * width + 9 * width * width + width * c4
                    + 2 * c4 * cr) * bfb + (2 * width + 2 * c4 + cr) * f32)
    return stream + weights + int(body * 1.3)          # 30% slack for temporaries


def _pick_nb(n, footprint, budget, prefer_even_steps):
    fits = [d for d in range(1, n + 1) if n % d == 0 and footprint(d) <= budget]
    if not fits:
        return 1
    if prefer_even_steps:                 # keep both v7x TensorCores busy
        even = [d for d in fits if (n // d) % 2 == 0]
        if even:
            return max(even)
    return max(fits)                      # single TC: fewest grid steps


# --------------------------------------------------------------------------
# Forward
# --------------------------------------------------------------------------
def bottleneck_forward(x_nchw, params, *, eps=1e-5, nb=None):
    """SE-Bottleneck forward (stride=1, groups=1, dilation=1, no downsample)."""
    N, Cin, H, W = x_nchw.shape
    HW = H * W
    width = params['conv1_w'].shape[0]
    C4 = params['conv3_w'].shape[0]
    Cr = params['se_fc1_w'].shape[0]
    assert Cin == C4, "identity path requires inplanes == planes * expansion"

    # ---- fold BN into conv weights / biases (inference semantics) ----
    w1f, b1f = _bn_fold(params['conv1_w'], *params['bn1'], eps)   # (width,Cin)
    w2f, b2f = _bn_fold(params['conv2_w'], *params['bn2'], eps)   # (width,width,3,3)
    w3f, b3f = _bn_fold(params['conv3_w'], *params['bn3'], eps)   # (C4,width)

    # ---- matmul-ready, lane-dense, bf16 operand layouts ----
    bf = jnp.bfloat16
    w1t = w1f.T.astype(bf)                                        # (Cin, width)
    # (co,ci,kh,kw) -> (kh, kw, ci, co) -> (3, 3*ci, co): per-dy weight, K=3*ci
    w2cat = jnp.transpose(w2f, (2, 3, 1, 0)).reshape(3, 3 * width, width).astype(bf)
    w3t = w3f.T.astype(bf)                                        # (width, C4)
    wse1 = params['se_fc1_w'].T.astype(bf)                        # (C4, Cr)
    wse2 = params['se_fc2_w'].T.astype(bf)                        # (Cr, C4)
    b1r = b1f.reshape(1, width).astype(jnp.float32)
    b2r = b2f.reshape(1, width).astype(jnp.float32)
    b3r = b3f.reshape(1, C4).astype(jnp.float32)
    bse1 = params['se_fc1_b'].reshape(1, Cr).astype(jnp.float32)
    bse2 = params['se_fc2_b'].reshape(1, C4).astype(jnp.float32)

    # ---- layout plumbing: NCHW -> (N, HW, C) channels-last, bf16 ----
    # TODO(synk): these transposes are full HBM passes; keep the surrounding
    # model channels-last to eliminate them entirely.
    x_flat = jnp.transpose(x_nchw, (0, 2, 3, 1)).reshape(N, HW, Cin).astype(bf)

    # ---- generation-aware batch-block pick & VMEM limit ----
    vmem_cap = _vmem_capacity_bytes()
    two_tensorcores = vmem_cap <= 64 * 1024 * 1024                # v7x heuristic
    footprint = lambda b: _per_step_vmem_bytes(b, H, W, Cin, width, C4, Cr)
    if nb is None:
        nb = _pick_nb(N, footprint, int(vmem_cap * 0.75), two_tensorcores)
    assert N % nb == 0, (N, nb)
    steps = N // nb
    assert footprint(nb) <= vmem_cap, (
        f"batch block nb={nb} needs ~{footprint(nb)}B VMEM > capacity {vmem_cap}B")

    vmem_limit = int(min(vmem_cap,
                         max(footprint(nb) + 8 * 1024 * 1024, 32 * 1024 * 1024)))
    cp = pltpu.CompilerParams(dimension_semantics=("parallel",),
                              vmem_limit_bytes=vmem_limit)

    flops = 2 * N * HW * (Cin * width + 9 * width * width + width * C4) \
        + 4 * N * C4 * Cr
    bytes_accessed = 2 * N * HW * Cin + 4 * N * HW * C4 \
        + 2 * (Cin * width + 9 * width * width + width * C4 + 2 * C4 * Cr)

    out3 = pl.pallas_call(
        functools.partial(_bottleneck_fused_kernel, H=H, W=W),
        out_shape=jax.ShapeDtypeStruct((N, HW, C4), jnp.float32),
        grid_spec=pltpu.PrefetchScalarGridSpec(
            num_scalar_prefetch=0, grid=(steps,),
            in_specs=[
                pl.BlockSpec((nb, HW, Cin), lambda n: (n, 0, 0)),      # x / identity
                pl.BlockSpec((Cin, width), lambda n: (0, 0)),          # w1
                pl.BlockSpec((1, width), lambda n: (0, 0)),            # b1
                pl.BlockSpec((3, 3 * width, width), lambda n: (0, 0, 0)),  # w2 (K=3ci)
                pl.BlockSpec((1, width), lambda n: (0, 0)),            # b2
                pl.BlockSpec((width, C4), lambda n: (0, 0)),           # w3
                pl.BlockSpec((1, C4), lambda n: (0, 0)),               # b3
                pl.BlockSpec((C4, Cr), lambda n: (0, 0)),              # se fc1 w
                pl.BlockSpec((1, Cr), lambda n: (0, 0)),               # se fc1 b
                pl.BlockSpec((Cr, C4), lambda n: (0, 0)),              # se fc2 w
                pl.BlockSpec((1, C4), lambda n: (0, 0)),               # se fc2 b
            ],
            out_specs=pl.BlockSpec((nb, HW, C4), lambda n: (n, 0, 0)),
        ),
        compiler_params=cp,
        cost_estimate=pl.CostEstimate(flops=int(flops),
                                      transcendentals=int(N * C4),
                                      bytes_accessed=int(bytes_accessed)),
    )(x_flat, w1t, b1r, w2cat, b2r, w3t, b3r, wse1, bse1, wse2, bse2)

    # (N, HW, C4) -> NCHW
    return jnp.transpose(out3.reshape(N, H, W, C4), (0, 3, 1, 2)).astype(x_nchw.dtype)


# --------------------------------------------------------------------------
# Pure-JAX reference (matches PyTorch eval-mode forward)
# --------------------------------------------------------------------------
def bottleneck_ref(x, p, eps=1e-5):
    hp = jax.lax.Precision.HIGHEST

    def bn(y, stats):
        g, b, m, v = stats
        inv = g / jnp.sqrt(v + eps)
        return (y - m[None, :, None, None]) * inv[None, :, None, None] \
            + b[None, :, None, None]

    out = jnp.einsum('nchw,oc->nohw', x, p['conv1_w'], precision=hp)
    out = jax.nn.relu(bn(out, p['bn1']))
    out = jax.lax.conv_general_dilated(
        out, p['conv2_w'], window_strides=(1, 1), padding=((1, 1), (1, 1)),
        dimension_numbers=('NCHW', 'OIHW', 'NCHW'), precision=hp)
    out = jax.nn.relu(bn(out, p['bn2']))
    out = jnp.einsum('nchw,oc->nohw', out, p['conv3_w'], precision=hp)
    out = bn(out, p['bn3'])
    # SELayer
    xm = out.mean(axis=(2, 3), keepdims=True)
    g = jax.nn.relu(jnp.einsum('nchw,oc->nohw', xm, p['se_fc1_w'], precision=hp)
                    + p['se_fc1_b'][None, :, None, None])
    s = jax.nn.sigmoid(jnp.einsum('nchw,oc->nohw', g, p['se_fc2_w'], precision=hp)
                       + p['se_fc2_b'][None, :, None, None])
    out = out * s + x
    return jax.nn.relu(out)


# --------------------------------------------------------------------------
if __name__ == "__main__":
    N, H, W = 2, 16, 16
    planes, expansion, reduction = 4, 4, 4
    width = planes                    # base_width=64, groups=1
    c4 = planes * expansion           # 16
    inplanes = c4                     # identity path (downsample=None)
    cr = c4 // reduction

    key = jax.random.PRNGKey(0)
    k = list(jax.random.split(key, 20))

    def nrm(kk, shape, scale=1.0):
        return scale * jax.random.normal(kk, shape, dtype=jnp.float32)

    def bn_params(k0, k1, k2, k3, c):
        gamma = 1.0 + 0.1 * jax.random.normal(k0, (c,), dtype=jnp.float32)
        beta = 0.1 * jax.random.normal(k1, (c,), dtype=jnp.float32)
        mean = 0.1 * jax.random.normal(k2, (c,), dtype=jnp.float32)
        var = 0.5 + 0.2 * jnp.abs(jax.random.normal(k3, (c,), dtype=jnp.float32))
        return (gamma, beta, mean, var)

    x = nrm(k[0], (N, inplanes, H, W))
    params = {
        'conv1_w': nrm(k[1], (width, inplanes), 0.5 * (2.0 / inplanes) ** 0.5),
        'bn1': bn_params(k[2], k[3], k[4], k[5], width),
        'conv2_w': nrm(k[6], (width, width, 3, 3), 0.5 * (2.0 / (9 * width)) ** 0.5),
        'bn2': bn_params(k[7], k[8], k[9], k[10], width),
        'conv3_w': nrm(k[11], (c4, width), 0.5 * (2.0 / width) ** 0.5),
        'bn3': bn_params(k[12], k[13], k[14], k[15], c4),
        'se_fc1_w': nrm(k[16], (cr, c4), (1.0 / c4) ** 0.5),
        'se_fc1_b': nrm(k[17], (cr,), 0.1),
        'se_fc2_w': nrm(k[18], (c4, cr), (1.0 / cr) ** 0.5),
        'se_fc2_b': nrm(k[19], (c4,), 0.1),
    }

    out = jax.jit(bottleneck_forward)(x, params)
    out = jax.block_until_ready(out)

    ref = bottleneck_ref(x, params)
    assert out.shape == ref.shape, (out.shape, ref.shape)
    assert jnp.allclose(out, ref, atol=4e-2, rtol=4e-2), (
        "mismatch vs reference: max abs err = "
        f"{float(jnp.max(jnp.abs(out - ref)))}")

    print("KERNEL_OK")
</pallas_src>

<mosaic_0001>
module attributes {stable_mosaic.version = 11 : i64} {
  func.func @_bottleneck_fused_kernel(%arg0: i32, %arg1: memref<1x256x16xbf16, #tpu.memory_space<vmem>>, %arg2: memref<16x4xbf16, #tpu.memory_space<vmem>>, %arg3: memref<1x4xf32, #tpu.memory_space<vmem>>, %arg4: memref<3x12x4xbf16, #tpu.memory_space<vmem>>, %arg5: memref<1x4xf32, #tpu.memory_space<vmem>>, %arg6: memref<4x16xbf16, #tpu.memory_space<vmem>>, %arg7: memref<1x16xf32, #tpu.memory_space<vmem>>, %arg8: memref<16x4xbf16, #tpu.memory_space<vmem>>, %arg9: memref<1x4xf32, #tpu.memory_space<vmem>>, %arg10: memref<4x16xbf16, #tpu.memory_space<vmem>>, %arg11: memref<1x16xf32, #tpu.memory_space<vmem>>, %arg12: memref<1x256x16xf32, #tpu.memory_space<vmem>>) attributes {dimension_semantics = [#tpu.dimension_semantics<parallel>], iteration_bounds = array<i64: 2>, scalar_prefetch = 0 : i64, scratch_operands = 0 : i64, tpu.core_type = #tpu.core_type<tc>, window_params = [{transform_indices = @transform_0, window_bounds = array<i64: 1, 256, 16>}, {pipeline_mode = #tpu.pipeline_mode<synchronous>, transform_indices = @transform_1, window_bounds = array<i64: 16, 4>}, {pipeline_mode = #tpu.pipeline_mode<synchronous>, transform_indices = @transform_2, window_bounds = array<i64: 1, 4>}, {pipeline_mode = #tpu.pipeline_mode<synchronous>, transform_indices = @transform_3, window_bounds = array<i64: 3, 12, 4>}, {pipeline_mode = #tpu.pipeline_mode<synchronous>, transform_indices = @transform_4, window_bounds = array<i64: 1, 4>}, {pipeline_mode = #tpu.pipeline_mode<synchronous>, transform_indices = @transform_5, window_bounds = array<i64: 4, 16>}, {pipeline_mode = #tpu.pipeline_mode<synchronous>, transform_indices = @transform_6, window_bounds = array<i64: 1, 16>}, {pipeline_mode = #tpu.pipeline_mode<synchronous>, transform_indices = @transform_7, window_bounds = array<i64: 16, 4>}, {pipeline_mode = #tpu.pipeline_mode<synchronous>, transform_indices = @transform_8, window_bounds = array<i64: 1, 4>}, {pipeline_mode = #tpu.pipeline_mode<synchronous>, transform_indices = @transform_9, window_bounds = array<i64: 4, 16>}, {pipeline_mode = #tpu.pipeline_mode<synchronous>, transform_indices = @transform_10, window_bounds = array<i64: 1, 16>}, {transform_indices = @transform_11, window_bounds = array<i64: 1, 256, 16>}]} {
    %c0 = arith.constant 0 : index
    %c0_0 = arith.constant 0 : index
    %c0_1 = arith.constant 0 : index
    %0 = vector.load %arg1[%c0, %c0_0, %c0_1] : memref<1x256x16xbf16, #tpu.memory_space<vmem>>, vector<1x256x16xbf16>
    %1 = vector.shape_cast %0 : vector<1x256x16xbf16> to vector<256x16xbf16>
    %c0_2 = arith.constant 0 : index
    %c0_3 = arith.constant 0 : index
    %2 = vector.load %arg2[%c0_2, %c0_3] : memref<16x4xbf16, #tpu.memory_space<vmem>>, vector<16x4xbf16>
    %cst = arith.constant dense<0.000000e+00> : vector<256x4xf32>
    %3 = tpu.matmul %1, %2, %cst {dimension_numbers = #tpu.dot_dimension_numbers<[1], [0], [0], [1], [0, 0, 1, 1], [], []>} : vector<256x16xbf16>, vector<16x4xbf16>, vector<256x4xf32> -> vector<256x4xf32>
    %c0_4 = arith.constant 0 : index
    %c0_5 = arith.constant 0 : index
    %4 = vector.load %arg3[%c0_4, %c0_5] : memref<1x4xf32, #tpu.memory_space<vmem>>, vector<1x4xf32>
    %5 = vector.broadcast %4 : vector<1x4xf32> to vector<256x4xf32>
    %6 = arith.addf %3, %5 : vector<256x4xf32>
    %cst_6 = arith.constant 0.000000e+00 : f32
    %7 = vector.broadcast %cst_6 : f32 to vector<256x4xf32>
    %8 = arith.maximumf %6, %7 : vector<256x4xf32>
    %9 = arith.truncf %8 : vector<256x4xf32> to vector<256x4xbf16>
    %10 = vector.shape_cast %9 : vector<256x4xbf16> to vector<1x16x16x4xbf16>
    %cst_7 = arith.constant 0.000000e+00 : bf16
    %11 = vector.broadcast %cst_7 : bf16 to vector<1x16x1x4xbf16>
    %cst_8 = arith.constant 0.000000e+00 : bf16
    %12 = vector.broadcast %cst_8 : bf16 to vector<1x1x18x4xbf16>
    %13 = tpu.concatenate %11, %10, %11 in 2 : vector<1x16x1x4xbf16>, vector<1x16x16x4xbf16>, vector<1x16x1x4xbf16> -> vector<1x16x18x4xbf16>
    %14 = tpu.concatenate %12, %13, %12 in 1 : vector<1x1x18x4xbf16>, vector<1x16x18x4xbf16>, vector<1x1x18x4xbf16> -> vector<1x18x18x4xbf16>
    %15 = vector.extract_strided_slice %14 {offsets = [0, 0, 0, 0], sizes = [1, 18, 16, 4], strides = [1, 1, 1, 1]} : vector<1x18x18x4xbf16> to vector<1x18x16x4xbf16>
    %16 = vector.extract_strided_slice %14 {offsets = [0, 0, 1, 0], sizes = [1, 18, 16, 4], strides = [1, 1, 1, 1]} : vector<1x18x18x4xbf16> to vector<1x18x16x4xbf16>
    %17 = vector.extract_strided_slice %14 {offsets = [0, 0, 2, 0], sizes = [1, 18, 16, 4], strides = [1, 1, 1, 1]} : vector<1x18x18x4xbf16> to vector<1x18x16x4xbf16>
    %18 = tpu.concatenate %15, %16, %17 in 3 : vector<1x18x16x4xbf16>, vector<1x18x16x4xbf16>, vector<1x18x16x4xbf16> -> vector<1x18x16x12xbf16>
    %cst_9 = arith.constant 0.000000e+00 : f32
    %19 = vector.broadcast %cst_9 : f32 to vector<256x4xf32>
    %20 = vector.extract_strided_slice %18 {offsets = [0, 0, 0, 0], sizes = [1, 16, 16, 12], strides = [1, 1, 1, 1]} : vector<1x18x16x12xbf16> to vector<1x16x16x12xbf16>
    %21 = vector.shape_cast %20 : vector<1x16x16x12xbf16> to vector<256x12xbf16>
    %c0_10 = arith.constant 0 : index
    %c0_11 = arith.constant 0 : index
    %c0_12 = arith.constant 0 : index
    %22 = vector.load %arg4[%c0_10, %c0_11, %c0_12] : memref<3x12x4xbf16, #tpu.memory_space<vmem>>, vector<1x12x4xbf16>
    %23 = vector.shape_cast %22 : vector<1x12x4xbf16> to vector<12x4xbf16>
    %cst_13 = arith.constant dense<0.000000e+00> : vector<256x4xf32>
    %24 = tpu.matmul %21, %23, %cst_13 {dimension_numbers = #tpu.dot_dimension_numbers<[1], [0], [0], [1], [0, 0, 1, 1], [], []>} : vector<256x12xbf16>, vector<12x4xbf16>, vector<256x4xf32> -> vector<256x4xf32>
    %25 = arith.addf %19, %24 : vector<256x4xf32>
    %26 = vector.extract_strided_slice %18 {offsets = [0, 1, 0, 0], sizes = [1, 16, 16, 12], strides = [1, 1, 1, 1]} : vector<1x18x16x12xbf16> to vector<1x16x16x12xbf16>
    %27 = vector.shape_cast %26 : vector<1x16x16x12xbf16> to vector<256x12xbf16>
    %c1 = arith.constant 1 : index
    %c0_14 = arith.constant 0 : index
    %c0_15 = arith.constant 0 : index
    %28 = vector.load %arg4[%c1, %c0_14, %c0_15] : memref<3x12x4xbf16, #tpu.memory_space<vmem>>, vector<1x12x4xbf16>
    %29 = vector.shape_cast %28 : vector<1x12x4xbf16> to vector<12x4xbf16>
    %cst_16 = arith.constant dense<0.000000e+00> : vector<256x4xf32>
    %30 = tpu.matmul %27, %29, %cst_16 {dimension_numbers = #tpu.dot_dimension_numbers<[1], [0], [0], [1], [0, 0, 1, 1], [], []>} : vector<256x12xbf16>, vector<12x4xbf16>, vector<256x4xf32> -> vector<256x4xf32>
    %31 = arith.addf %25, %30 : vector<256x4xf32>
    %32 = vector.extract_strided_slice %18 {offsets = [0, 2, 0, 0], sizes = [1, 16, 16, 12], strides = [1, 1, 1, 1]} : vector<1x18x16x12xbf16> to vector<1x16x16x12xbf16>
    %33 = vector.shape_cast %32 : vector<1x16x16x12xbf16> to vector<256x12xbf16>
    %c2 = arith.constant 2 : index
    %c0_17 = arith.constant 0 : index
    %c0_18 = arith.constant 0 : index
    %34 = vector.load %arg4[%c2, %c0_17, %c0_18] : memref<3x12x4xbf16, #tpu.memory_space<vmem>>, vector<1x12x4xbf16>
    %35 = vector.shape_cast %34 : vector<1x12x4xbf16> to vector<12x4xbf16>
    %cst_19 = arith.constant dense<0.000000e+00> : vector<256x4xf32>
    %36 = tpu.matmul %33, %35, %cst_19 {dimension_numbers = #tpu.dot_dimension_numbers<[1], [0], [0], [1], [0, 0, 1, 1], [], []>} : vector<256x12xbf16>, vector<12x4xbf16>, vector<256x4xf32> -> vector<256x4xf32>
    %37 = arith.addf %31, %36 : vector<256x4xf32>
    %c0_20 = arith.constant 0 : index
    %c0_21 = arith.constant 0 : index
    %38 = vector.load %arg5[%c0_20, %c0_21] : memref<1x4xf32, #tpu.memory_space<vmem>>, vector<1x4xf32>
    %39 = vector.broadcast %38 : vector<1x4xf32> to vector<256x4xf32>
    %40 = arith.addf %37, %39 : vector<256x4xf32>
    %cst_22 = arith.constant 0.000000e+00 : f32
    %41 = vector.broadcast %cst_22 : f32 to vector<256x4xf32>
    %42 = arith.maximumf %40, %41 : vector<256x4xf32>
    %43 = arith.truncf %42 : vector<256x4xf32> to vector<256x4xbf16>
    %c0_23 = arith.constant 0 : index
    %c0_24 = arith.constant 0 : index
    %44 = vector.load %arg6[%c0_23, %c0_24] : memref<4x16xbf16, #tpu.memory_space<vmem>>, vector<4x16xbf16>
    %cst_25 = arith.constant dense<0.000000e+00> : vector<256x16xf32>
    %45 = tpu.matmul %43, %44, %cst_25 {dimension_numbers = #tpu.dot_dimension_numbers<[1], [0], [0], [1], [0, 0, 1, 1], [], []>} : vector<256x4xbf16>, vector<4x16xbf16>, vector<256x16xf32> -> vector<256x16xf32>
    %c0_26 = arith.constant 0 : index
    %c0_27 = arith.constant 0 : index
    %46 = vector.load %arg7[%c0_26, %c0_27] : memref<1x16xf32, #tpu.memory_space<vmem>>, vector<1x16xf32>
    %47 = vector.broadcast %46 : vector<1x16xf32> to vector<256x16xf32>
    %48 = arith.addf %45, %47 : vector<256x16xf32>
    %49 = vector.shape_cast %48 : vector<256x16xf32> to vector<1x256x16xf32>
    %cst_28 = arith.constant dense<0.000000e+00> : vector<1x16xf32>
    %50 = vector.multi_reduction <add>, %49, %cst_28 [1] : vector<1x256x16xf32> to vector<1x16xf32>
    %cst_29 = arith.constant 2.560000e+02 : f32
    %51 = vector.broadcast %cst_29 : f32 to vector<1x16xf32>
    %52 = arith.divf %50, %51 : vector<1x16xf32>
    %53 = arith.truncf %52 : vector<1x16xf32> to vector<1x16xbf16>
    %c0_30 = arith.constant 0 : index
    %c0_31 = arith.constant 0 : index
    %54 = vector.load %arg8[%c0_30, %c0_31] : memref<16x4xbf16, #tpu.memory_space<vmem>>, vector<16x4xbf16>
    %cst_32 = arith.constant dense<0.000000e+00> : vector<1x4xf32>
    %55 = tpu.matmul %53, %54, %cst_32 {dimension_numbers = #tpu.dot_dimension_numbers<[1], [0], [0], [1], [0, 0, 1, 1], [], []>} : vector<1x16xbf16>, vector<16x4xbf16>, vector<1x4xf32> -> vector<1x4xf32>
    %c0_33 = arith.constant 0 : index
    %c0_34 = arith.constant 0 : index
    %56 = vector.load %arg9[%c0_33, %c0_34] : memref<1x4xf32, #tpu.memory_space<vmem>>, vector<1x4xf32>
    %57 = arith.addf %55, %56 : vector<1x4xf32>
    %cst_35 = arith.constant 0.000000e+00 : f32
    %58 = vector.broadcast %cst_35 : f32 to vector<1x4xf32>
    %59 = arith.maximumf %57, %58 : vector<1x4xf32>
    %60 = arith.truncf %59 : vector<1x4xf32> to vector<1x4xbf16>
    %c0_36 = arith.constant 0 : index
    %c0_37 = arith.constant 0 : index
    %61 = vector.load %arg10[%c0_36, %c0_37] : memref<4x16xbf16, #tpu.memory_space<vmem>>, vector<4x16xbf16>
    %cst_38 = arith.constant dense<0.000000e+00> : vector<1x16xf32>
    %62 = tpu.matmul %60, %61, %cst_38 {dimension_numbers = #tpu.dot_dimension_numbers<[1], [0], [0], [1], [0, 0, 1, 1], [], []>} : vector<1x4xbf16>, vector<4x16xbf16>, vector<1x16xf32> -> vector<1x16xf32>
    %c0_39 = arith.constant 0 : index
    %c0_40 = arith.constant 0 : index
    %63 = vector.load %arg11[%c0_39, %c0_40] : memref<1x16xf32, #tpu.memory_space<vmem>>, vector<1x16xf32>
    %64 = arith.addf %62, %63 : vector<1x16xf32>
    %65 = arith.negf %64 : vector<1x16xf32>
    %66 = math.exp %65 : vector<1x16xf32>
    %cst_41 = arith.constant 1.000000e+00 : f32
    %67 = vector.broadcast %cst_41 : f32 to vector<1x16xf32>
    %68 = arith.addf %67, %66 : vector<1x16xf32>
    %69 = arith.divf %67, %68 : vector<1x16xf32>
    %70 = vector.shape_cast %69 : vector<1x16xf32> to vector<1x1x16xf32>
    %71 = vector.broadcast %70 : vector<1x1x16xf32> to vector<1x256x16xf32>
    %72 = arith.mulf %49, %71 : vector<1x256x16xf32>
    %73 = arith.extf %0 : vector<1x256x16xbf16> to vector<1x256x16xf32>
    %74 = arith.addf %72, %73 : vector<1x256x16xf32>
    %cst_42 = arith.constant 0.000000e+00 : f32
    %75 = vector.broadcast %cst_42 : f32 to vector<1x256x16xf32>
    %76 = arith.maximumf %74, %75 : vector<1x256x16xf32>
    %c0_43 = arith.constant 0 : index
    %c0_44 = arith.constant 0 : index
    %c0_45 = arith.constant 0 : index
    %77 = vector.load %arg12[%c0_43, %c0_44, %c0_45] : memref<1x256x16xf32, #tpu.memory_space<vmem>>, vector<1x256x16xf32>
    tpu.vector_store %arg12[%c0_43, %c0_44, %c0_45], %76 {strides = array<i32>} : memref<1x256x16xf32, #tpu.memory_space<vmem>>, vector<1x256x16xf32>,
    return
  }
  func.func @transform_0(%arg0: i32) -> (i32, i32, i32) {
    %c0_i32 = arith.constant 0 : i32
    %c0_i32_0 = arith.constant 0 : i32
    %c0_i32_1 = arith.constant 0 : i32
    return %arg0, %c0_i32, %c0_i32_0 : i32, i32, i32
  }
  func.func @transform_1(%arg0: i32) -> (i32, i32) {
    %c0_i32 = arith.constant 0 : i32
    %c0_i32_0 = arith.constant 0 : i32
    %c0_i32_1 = arith.constant 0 : i32
    return %c0_i32, %c0_i32_0 : i32, i32
  }
  func.func @transform_2(%arg0: i32) -> (i32, i32) {
    %c0_i32 = arith.constant 0 : i32
    %c0_i32_0 = arith.constant 0 : i32
    %c0_i32_1 = arith.constant 0 : i32
    return %c0_i32, %c0_i32_0 : i32, i32
  }
  func.func @transform_3(%arg0: i32) -> (i32, i32, i32) {
    %c0_i32 = arith.constant 0 : i32
    %c0_i32_0 = arith.constant 0 : i32
    %c0_i32_1 = arith.constant 0 : i32
    %c0_i32_2 = arith.constant 0 : i32
    return %c0_i32, %c0_i32_0, %c0_i32_1 : i32, i32, i32
  }
  func.func @transform_4(%arg0: i32) -> (i32, i32) {
    %c0_i32 = arith.constant 0 : i32
    %c0_i32_0 = arith.constant 0 : i32
    %c0_i32_1 = arith.constant 0 : i32
    return %c0_i32, %c0_i32_0 : i32, i32
  }
  func.func @transform_5(%arg0: i32) -> (i32, i32) {
    %c0_i32 = arith.constant 0 : i32
    %c0_i32_0 = arith.constant 0 : i32
    %c0_i32_1 = arith.constant 0 : i32
    return %c0_i32, %c0_i32_0 : i32, i32
  }
  func.func @transform_6(%arg0: i32) -> (i32, i32) {
    %c0_i32 = arith.constant 0 : i32
    %c0_i32_0 = arith.constant 0 : i32
    %c0_i32_1 = arith.constant 0 : i32
    return %c0_i32, %c0_i32_0 : i32, i32
  }
  func.func @transform_7(%arg0: i32) -> (i32, i32) {
    %c0_i32 = arith.constant 0 : i32
    %c0_i32_0 = arith.constant 0 : i32
    %c0_i32_1 = arith.constant 0 : i32
    return %c0_i32, %c0_i32_0 : i32, i32
  }
  func.func @transform_8(%arg0: i32) -> (i32, i32) {
    %c0_i32 = arith.constant 0 : i32
    %c0_i32_0 = arith.constant 0 : i32
    %c0_i32_1 = arith.constant 0 : i32
    return %c0_i32, %c0_i32_0 : i32, i32
  }
  func.func @transform_9(%arg0: i32) -> (i32, i32) {
    %c0_i32 = arith.constant 0 : i32
    %c0_i32_0 = arith.constant 0 : i32
    %c0_i32_1 = arith.constant 0 : i32
    return %c0_i32, %c0_i32_0 : i32, i32
  }
  func.func @transform_10(%arg0: i32) -> (i32, i32) {
    %c0_i32 = arith.constant 0 : i32
    %c0_i32_0 = arith.constant 0 : i32
    %c0_i32_1 = arith.constant 0 : i32
    return %c0_i32, %c0_i32_0 : i32, i32
  }
  func.func @transform_11(%arg0: i32) -> (i32, i32, i32) {
    %c0_i32 = arith.constant 0 : i32
    %c0_i32_0 = arith.constant 0 : i32
    %c0_i32_1 = arith.constant 0 : i32
    return %arg0, %c0_i32, %c0_i32_0 : i32, i32, i32
  }
}

</mosaic_0001>

<bundles_post_ra>
// kernel: bottleneck_forward.1
= control target key start
LH: loop header
LB: loop body
LE: loop exit
PB: predicated region body
PF: predicated region fallthrough
CT: control target
= control target key end

     0   :  { %s3274_s17 = smov 0   ;;  %s4339_s0 = inlined_call_operand.vmem [shape: bf16[2,256,16], index: 0, kind: input, shape index: {}]   ;;  %s4340_s1 = inlined_call_operand.vmem [shape: bf16[16,4], index: 1, kind: input, shape index: {}]   ;;  %s4341_s2 = inlined_call_operand.vmem [shape: f32[1,4], index: 2, kind: input, shape index: {}]   ;;  %s4342_s3 = inlined_call_operand.vmem [shape: bf16[3,12,4], index: 3, kind: input, shape index: {}]   ;;  %s4343_s4 = inlined_call_operand.vmem [shape: f32[1,4], index: 4, kind: input, shape index: {}]   ;;  %s4344_s5 = inlined_call_operand.vmem [shape: bf16[4,16], index: 5, kind: input, shape index: {}]   ;;  %s4345_s6 = inlined_call_operand.vmem [shape: f32[1,16], index: 6, kind: input, shape index: {}]   ;;  %s4346_s7 = inlined_call_operand.vmem [shape: bf16[16,4], index: 7, kind: input, shape index: {}]   ;;  %s4347_s8 = inlined_call_operand.vmem [shape: f32[1,4], index: 8, kind: input, shape index: {}]   ;;  %s4348_s9 = inlined_call_operand.vmem [shape: bf16[4,16], index: 9, kind: input, shape index: {}]   ;;  %s4349_s10 = inlined_call_operand.vmem [shape: f32[1,16], index: 10, kind: input, shape index: {}]   ;;  %s4350_s11 = inlined_call_operand.vmem [shape: f32[2,256,16], index: 11, kind: output, shape index: {}]  }
   0x1 LB: > { %s2665_s18 = sadd.s32 4294967295, %s3207_s17   ;;  %p2669_p0 = scmp.ge.s32.totalorder %s3207_s17, 1  ;;  %s3207_s17 = sphi %s3274_s17, %s21_s17  }
   0x2   : > { %p337_p1 = scmp.lt.s32.totalorder %s3207_s17, 3 }
   0x4   : > { %p338_p2 = pnand %p2669_p0, %p337_p1 }
   0x5   : > { %v3144_v0 = vld [vmem:[%s4340_s1] sm:$0xff] (!%p338_p2)   ;;  %p377_p3 = scmp.lt.s32.totalorder (!%p338_p2), %s2665_s18, 1  ;;  %vm515_vm0 = vcmask (!%p338_p2), 130048   ;;  %vm917_vm1 = vcmask (!%p338_p2), 1040384   ;;  %vm918_vm2 = vsmask.f32 (!%p338_p2), 256 }
   0x6   : > { %341 = sbr.rel (%p338_p2) target bundleno = 1531 (0x5fb), region = 64  ;;  %2878 = vmatprep.subr.bf16.mxu0 (!%p338_p2), %v3144_v0  ;;  %v3328_v17 = vld [vmem:[%s4341_s2] ss:$0 sm:$0xff] (!%p338_p2)  ;;  %vm3365_vm3 = vmand (!%p338_p2), %vm917_vm1, %vm918_vm2  ;;  %vm1220_vm4 = vcmask (!%p338_p2), 1046528   ;;  %vm952_vm5 = vsmask.f32 (!%p338_p2), 7424 }
   0x7   : > { %2879 = vmatpush3.bf16.msra.mxu0 (!%p338_p2), %v3144_v0  ;;  %s3209_s27 = smov (!%p338_p2), 8   ;;  %s3210_s28 = smov (!%p338_p2), 4   ;;  %vm1418_vm6 = vcmask (!%p338_p2), 1045504   ;;  %vm1305_vm7 = vcmask (!%p338_p2), 31744   ;;  %vm1340_vm8 = vcmask (!%p338_p2), 64512   ;;  %vm1385_vm9 = vcmask (!%p338_p2), 97280  }
   0x8   : > { %vm2101_vm10 = vcmask (!%p338_p2), 1041408   ;;  %vm3213_vm11 = vmmov (!%p338_p2), 0  }
   0xd   : > { %s4381_s18 = smov (!%p377_p3, %s2665_s18), 1 }
   0xe   : > { %s2787_s21 = sshll.u32 %s4381_s18, 7 }
   0xf   : > { %s3291_s24 = scalar_lea.vmem %s4339_s0, %s2787_s21 }
  0x10   : > { %v388_v1 = vld [vmem:[%s3291_s24] sm:$0xff]   ;;  %v390_v2 = vld [vmem:[%s3291_s24 + $0x8] sm:$0xff]   ;;  %v392_v3 = vld [vmem:[%s3291_s24 + $0x10] sm:$0xff]  }
  0x11   : > { %2880 = vmatprep.mubr.msk.bf16.mxu0 %vm515_vm0, %v388_v1  ;;  %v394_v4 = vld [vmem:[%s3291_s24 + $0x18] sm:$0xff]   ;;  %v396_v5 = vld [vmem:[%s3291_s24 + $0x20] sm:$0xff]   ;;  %v398_v6 = vld [vmem:[%s3291_s24 + $0x28] sm:$0xff]  }
  0x12   : > { %2881 = vmatmul.mubr.msk.bf16.vlgmr.msra.gmra.mrb[0].mxu0 %vm515_vm0, %v390_v2  ;;  %v400_v7 = vld [vmem:[%s3291_s24 + $0x30] sm:$0xff]   ;;  %v402_v8 = vld [vmem:[%s3291_s24 + $0x38] sm:$0xff]   ;;  %v404_v9 = vld [vmem:[%s3291_s24 + $0x40] sm:$0xff]  }
  0x13   : > { %2884 = vmatprep.mubr.msk.bf16.mxu0 %vm515_vm0, %v392_v3  ;;  %v406_v10 = vld [vmem:[%s3291_s24 + $0x48] sm:$0xff]   ;;  %v408_v11 = vld [vmem:[%s3291_s24 + $0x50] sm:$0xff]   ;;  %v410_v12 = vld [vmem:[%s3291_s24 + $0x58] sm:$0xff]  }
  0x14   : > { %v412_v13 = vld [vmem:[%s3291_s24 + $0x60] sm:$0xff]   ;;  %v414_v14 = vld [vmem:[%s3291_s24 + $0x68] sm:$0xff]   ;;  %v416_v15 = vld [vmem:[%s3291_s24 + $0x70] sm:$0xff]  }
  0x15   : > { %v418_v16 = vld [vmem:[%s3291_s24 + $0x78] sm:$0xff]  }
  0x1a   : > { %2885 = vmatmul.mubr.msk.bf16.gmra.mrb[4].mxu0 %vm515_vm0, %v394_v4 }
  0x1b   : > { %2888 = vmatprep.mubr.msk.bf16.mxu0 %vm515_vm0, %v396_v5 }
  0x22   : > { %2889 = vmatmul.mubr.msk.bf16.gmra.mrb[8].mxu0 %vm515_vm0, %v398_v6 }
  0x23   : > { %2892 = vmatprep.mubr.msk.bf16.mxu0 %vm515_vm0, %v400_v7 }
  0x2a   : > { %2893 = vmatmul.mubr.msk.bf16.gmra.mrb[12].mxu0 %vm515_vm0, %v402_v8 }
  0x2b   : > { %2896 = vmatprep.mubr.msk.bf16.mxu0 %vm515_vm0, %v404_v9 }
  0x32   : > { %2897 = vmatmul.mubr.msk.bf16.gmra.mrb[16].mxu0 %vm515_vm0, %v406_v10 }
  0x33   : > { %2900 = vmatprep.mubr.msk.bf16.mxu0 %vm515_vm0, %v408_v11 }
  0x3a   : > { %2901 = vmatmul.mubr.msk.bf16.gmra.mrb[20].mxu0 %vm515_vm0, %v410_v12 }
  0x3b   : > { %2904 = vmatprep.mubr.msk.bf16.mxu0 %vm515_vm0, %v412_v13 }
  0x42   : > { %2905 = vmatmul.mubr.msk.bf16.gmra.mrb[24].mxu0 %vm515_vm0, %v414_v14 }
  0x43   : > { %2908 = vmatprep.mubr.msk.bf16.mxu0 %vm515_vm0, %v416_v15 }
  0x4a   : > { %2909 = vmatmul.mubr.msk.bf16.gmra.mrb[28].mxu0 %vm515_vm0, %v418_v16 }
  0xe5   : > { %v2882_v18 = vpop.f32.mrb[0].mxu0 }
  0xe6   : > { %v607_v19 = vadd.f32 %v2882_v18, %v3328_v17  ;;  %v598_v20 = vpop.f32.mrb[1].mxu0 }
  0xe7   : > { %v599_v21 = vadd.f32 %v3328_v17, %v598_v20  ;;  %v2883_v22 = vpop.f32.mrb[2].mxu0 }
  0xe8   : > { %v610_v23 = vadd.f32 %v2883_v22, %v3328_v17  ;;  %v601_v24 = vpop.f32.mrb[3].mxu0  ;;  %v727_v26 = vmax.f32 %v607_v19, 0.0 }
  0xe9   : > { %v602_v25 = vadd.f32 %v3328_v17, %v601_v24  ;;  %v725_v28 = vmax.f32 %v599_v21, 0.0 }
  0xea   : > { %v728_v27 = vmax.f32 %v610_v23, 0.0 }
  0xeb   : > { %v726_v29 = vmax.f32 %v602_v25, 0.0 }
  0xec   : > { %v3334_v30 = vpack.c.bf16 %v728_v27, %v727_v26 }
  0xed   : > { %v757_v31 = vpack.c.bf16 %v726_v29, %v725_v28  ;;  %v2886_v32 = vpop.f32.mrb[4].mxu0 }
  0xee   : > { %v623_v33 = vadd.f32 %v2886_v32, %v3328_v17  ;;  %v614_v34 = vpop.f32.mrb[5].mxu0  ;;  %v781_v21 = vshrl.u32 %v3334_v30, 16 }
  0xef   : > { %v615_v35 = vadd.f32 %v3328_v17, %v614_v34  ;;  %v2887_v36 = vpop.f32.mrb[6].mxu0  ;;  %v774_v3 = vshrl.u32 %v757_v31, 16  ;;  %v777_v16 = vshll.u32 %v757_v31, 16 }
  0xf0   : > { %v626_v37 = vadd.f32 %v2887_v36, %v3328_v17  ;;  %v617_v38 = vpop.f32.mrb[7].mxu0  ;;  %v731_v40 = vmax.f32 %v623_v33, 0.0 }
  0xf1   : > { %v618_v39 = vadd.f32 %v3328_v17, %v617_v38  ;;  %v729_v42 = vmax.f32 %v615_v35, 0.0  ;;  %v3356_v10 = vrot.slane %v774_v3, 7 }
  0xf2   : > { %v732_v41 = vmax.f32 %v626_v37, 0.0 }
  0xf3   : > { %v730_v43 = vmax.f32 %v618_v39, 0.0  ;;  %v779_v26 = vor.u32 %v777_v16, %v3356_v10  ;;  %v3371_v39 = vrot.slane %v781_v21, 7 }
  0xf4   : > { %v3340_v44 = vpack.c.bf16 %v732_v41, %v731_v40 }
  0xf5   : > { %v3342_v45 = vpack.c.bf16 %v730_v43, %v729_v42  ;;  %v2890_v46 = vpop.f32.mrb[8].mxu0  ;;  %v3379_v42 = vsel %vm3365_vm3, 0, %v779_v26 }
  0xf6   : > { %v639_v47 = vadd.f32 %v2890_v46, %v3328_v17  ;;  %v630_v48 = vpop.f32.mrb[9].mxu0 }
  0xf7   : > { %v631_v49 = vadd.f32 %v3328_v17, %v630_v48  ;;  %v2891_v50 = vpop.f32.mrb[10].mxu0 }
  0xf8   : > { %v642_v51 = vadd.f32 %v2891_v50, %v3328_v17  ;;  %v633_v52 = vpop.f32.mrb[11].mxu0  ;;  %v735_v54 = vmax.f32 %v639_v47, 0.0 }
  0xf9   : > { %v634_v53 = vadd.f32 %v3328_v17, %v633_v52  ;;  %v733_v56 = vmax.f32 %v631_v49, 0.0 }
  0xfa   : > { %v736_v55 = vmax.f32 %v642_v51, 0.0 }
  0xfb   : > { %v734_v57 = vmax.f32 %v634_v53, 0.0 }
  0xfc   : > { %v3348_v58 = vpack.c.bf16 %v736_v55, %v735_v54  ;;  %v788_v54 = vshrl.u32 %v3342_v45, 16 }
  0xfd   : > { %v3350_v59 = vpack.c.bf16 %v734_v57, %v733_v56  ;;  %v2894_v60 = vpop.f32.mrb[12].mxu0 }
  0xfe   : > { %v655_v61 = vadd.f32 %v2894_v60, %v3328_v17  ;;  %v646_v62 = vpop.f32.mrb[13].mxu0 }
  0xff   : > { %v647_v63 = vadd.f32 %v3328_v17, %v646_v62  ;;  %v2895_v0 = vpop.f32.mrb[14].mxu0 }
 0x100   : > { %v658_v1 = vadd.f32 %v2895_v0, %v3328_v17  ;;  %v649_v2 = vpop.f32.mrb[15].mxu0  ;;  %v739_v5 = vmax.f32 %v655_v61, 0.0 }
 0x101   : > { %v650_v4 = vadd.f32 %v3328_v17, %v649_v2  ;;  %v737_v7 = vmax.f32 %v647_v63, 0.0 }
 0x102   : > { %v740_v6 = vmax.f32 %v658_v1, 0.0 }
 0x103   : > { %v738_v8 = vmax.f32 %v650_v4, 0.0 }
 0x104   : > { %v764_v9 = vpack.c.bf16 %v740_v6, %v739_v5 }
 0x105   : > { %v763_v11 = vpack.c.bf16 %v738_v8, %v737_v7  ;;  %v2898_v12 = vpop.f32.mrb[16].mxu0 }
 0x106   : > { %v823_v13 = vshrl.u32 %v764_v9, 16  ;;  %v671_v14 = vadd.f32 %v2898_v12, %v3328_v17  ;;  %v662_v15 = vpop.f32.mrb[17].mxu0  ;;  %v826_v23 = vshll.u32 %v764_v9, 16 }
 0x107   : > { %v816_v18 = vshrl.u32 %v763_v11, 16  ;;  %v663_v19 = vadd.f32 %v3328_v17, %v662_v15  ;;  %v2899_v20 = vpop.f32.mrb[18].mxu0  ;;  %v819_v28 = vshll.u32 %v763_v11, 16 }
 0x108   : > { %v825_v22 = vrot.slane %v823_v13, 7  ;;  %v674_v24 = vadd.f32 %v2899_v20, %v3328_v17  ;;  %v665_v25 = vpop.f32.mrb[19].mxu0  ;;  %v743_v33 = vmax.f32 %v671_v14, 0.0 }
 0x109   : > { %v818_v27 = vrot.slane %v816_v18, 7  ;;  %v666_v29 = vadd.f32 %v3328_v17, %v665_v25  ;;  %v741_v36 = vmax.f32 %v663_v19, 0.0 }
 0x10a   : > { %v828_v32 = vor.u32 %v826_v23, %v825_v22  ;;  %v744_v34 = vmax.f32 %v674_v24, 0.0  ;;  %v3387_v48 = vsel %vm3365_vm3, %v825_v22, 0 }
 0x10b   : > { %v821_v35 = vor.u32 %v819_v28, %v818_v27  ;;  %v742_v37 = vmax.f32 %v666_v29, 0.0  ;;  %v942_v38 = vsel %vm3365_vm3, %v818_v27, 0  ;;  %v1245_v1 = vrot.slane %v3387_v48, 1 }
 0x10c   : > { %v3375_v40 = vsel %vm3365_vm3, 0, %v828_v32  ;;  %v766_v41 = vpack.c.bf16 %v744_v34, %v743_v33  ;;  %v1242_v53 = vrot.slane %v942_v38, 1  ;;  %v1041_v5 = vshll.u32 %v942_v38, 16 }
 0x10d   : > { %v765_v43 = vpack.c.bf16 %v742_v37, %v741_v36  ;;  %v2902_v46 = vpop.f32.mrb[20].mxu0  ;;  %v3383_v47 = vsel %vm3365_vm3, 0, %v821_v35  ;;  %v1244_v60 = vrot.slane %v3375_v40, 1  ;;  %v1048_v19 = vshll.u32 %v3375_v40, 16 }
 0x10e   : > { %v837_v49 = vshrl.u32 %v766_v41, 16  ;;  %v687_v50 = vadd.f32 %v2902_v46, %v3328_v17  ;;  %v678_v51 = vpop.f32.mrb[21].mxu0  ;;  %v1241_v52 = vrot.slane %v3383_v47, 1  ;;  %v840_v2 = vshll.u32 %v766_v41, 16 }
 0x10f   : > { %v830_v55 = vshrl.u32 %v765_v43, 16  ;;  %v679_v56 = vadd.f32 %v3328_v17, %v678_v51  ;;  %v2903_v57 = vpop.f32.mrb[22].mxu0  ;;  %v833_v6 = vshll.u32 %v765_v43, 16  ;;  %v1036_v9 = vshll.u32 %v3383_v47, 16 }
 0x110   : > { %v839_v61 = vrot.slane %v837_v49, 7  ;;  %v690_v62 = vadd.f32 %v2903_v57, %v3328_v17  ;;  %v681_v63 = vpop.f32.mrb[23].mxu0  ;;  %v1243_v0 = vsel %vm1220_vm4, %v1241_v52, %v1242_v53  ;;  %v747_v7 = vmax.f32 %v687_v50, 0.0 }
 0x111   : > { %v832_v3 = vrot.slane %v830_v55, 7  ;;  %v682_v4 = vadd.f32 %v3328_v17, %v681_v63  ;;  %1285 = vrot.lane.b32.xlu1 %v1243_v0, %s3209_s27  ;;  %v745_v11 = vmax.f32 %v679_v56, 0.0  ;;  %v1246_v13 = vsel %vm1220_vm4, %v1244_v60, %v1245_v1 }
 0x112   : > { %v748_v8 = vmax.f32 %v690_v62, 0.0  ;;  %v1034_v14 = vshrl.u32 %v3383_v47, 16  ;;  %v842_v15 = vor.u32 %v840_v2, %v839_v61  ;;  %v1038_v18 = vrot.slane %v1036_v9, 1 }
 0x113   : > { %v746_v12 = vmax.f32 %v682_v4, 0.0  ;;  %v835_v20 = vor.u32 %v833_v6, %v832_v3  ;;  %v1043_v23 = vrot.slane %v1041_v5, 1  ;;  %v1046_v24 = vshrl.u32 %v3375_v40, 16 }
 0x114   : > { %v768_v16 = vpack.c.bf16 %v748_v8, %v747_v7  ;;  %v1039_v27 = vor.u32 %v1038_v18, %v1034_v14  ;;  %v1053_v29 = vshll.u32 %v3387_v48, 16  ;;  %v3409_v32 = vsel %vm3365_vm3, %v839_v61, 0 }
 0x115   : > { %v767_v21 = vpack.c.bf16 %v746_v12, %v745_v11  ;;  %v2906_v22 = vpop.f32.mrb[24].mxu0  ;;  %1287 = vrot.lane.b32.xlu1 %v1246_v13, %s3209_s27  ;;  %v1050_v36 = vrot.slane %v1048_v19, 1  ;;  %v3414_v37 = vsel %vm3365_vm3, 0, %v842_v15  ;;  %v3420_v48 = vsel %vm3365_vm3, 0, %v835_v20 }
 0x116   : > { %v851_v25 = vshrl.u32 %v768_v16, 16  ;;  %v703_v26 = vadd.f32 %v2906_v22, %v3328_v17  ;;  %v694_v28 = vpop.f32.mrb[25].mxu0  ;;  %v1044_v41 = vsel %vm952_vm5, %v1039_v27, %v1043_v23  ;;  %v854_v49 = vshll.u32 %v768_v16, 16 }
 0x117   : > { %v844_v33 = vshrl.u32 %v767_v21, 16  ;;  %v695_v34 = vadd.f32 %v3328_v17, %v694_v28  ;;  %v2907_v35 = vpop.f32.mrb[26].mxu0  ;;  %1167 = vrot.lane.b32.xlu0 %v1044_v41, %s3210_s28  ;;  %v1051_v51 = vor.u32 %v1050_v36, %v1046_v24  ;;  %v1055_v56 = vrot.slane %v1053_v29, 1 }
 0x118   : > { %v853_v38 = vrot.slane %v851_v25, 7  ;;  %v706_v43 = vadd.f32 %v2907_v35, %v3328_v17  ;;  %v697_v46 = vpop.f32.mrb[27].mxu0  ;;  %v751_v53 = vmax.f32 %v703_v26, 0.0  ;;  %v847_v57 = vshll.u32 %v767_v21, 16 }
 0x119   : > { %v698_v50 = vadd.f32 %v3328_v17, %v697_v46  ;;  %v846_v52 = vrot.slane %v844_v33, 7  ;;  %v749_v60 = vmax.f32 %v695_v34, 0.0  ;;  %v1072_v62 = vshll.u32 %v3414_v37, 16 }
 0x11a   : > { %v752_v55 = vmax.f32 %v706_v43, 0.0  ;;  %v856_v63 = vor.u32 %v854_v49, %v853_v38  ;;  %v1056_v1 = vsel %vm952_vm5, %v1051_v51, %v1055_v56  ;;  %v1077_v2 = vshll.u32 %v3409_v32, 16 }
 0x11b   : > { %v750_v61 = vmax.f32 %v698_v50, 0.0  ;;  %v944_v4 = vsel %vm3365_vm3, %v832_v3, 0  ;;  %1169 = vrot.lane.b32.xlu0 %v1056_v1, %s3210_s28  ;;  %v1070_v6 = vshrl.u32 %v3414_v37, 16  ;;  %v1074_v7 = vrot.slane %v1072_v62, 1 }
 0x11c   : > { %v770_v0 = vpack.c.bf16 %v752_v55, %v751_v53  ;;  %v3433_v9 = vsel %vm3365_vm3, %v853_v38, 0  ;;  %v849_v11 = vor.u32 %v847_v57, %v846_v52  ;;  %v3437_v12 = vsel %vm3365_vm3, %v846_v52, 0 }
 0x11d   : > { %v769_v5 = vpack.c.bf16 %v750_v61, %v749_v60  ;;  %v2910_v8 = vpop.f32.mrb[28].mxu0  ;;  %v1075_v15 = vor.u32 %v1074_v7, %v1070_v6  ;;  %v1079_v3 = vrot.slane %v1077_v2, 1  ;;  %v1060_v18 = vshll.u32 %v3420_v48, 16 }
 0x11e   : > { %v865_v13 = vshrl.u32 %v770_v0, 16  ;;  %v710_v14 = vpop.f32.mrb[29].mxu0  ;;  %v719_v16 = vadd.f32 %v2910_v8, %v3328_v17  ;;  %v3443_v20 = vsel %vm3365_vm3, 0, %v856_v63  ;;  %v1058_v22 = vshrl.u32 %v3420_v48, 16 }
 0x11f   : > { %v2911_v19 = vpop.f32.mrb[30].mxu0  ;;  %v858_v21 = vshrl.u32 %v769_v5, 16  ;;  %v1065_v23 = vshll.u32 %v944_v4, 16  ;;  %v1080_v26 = vsel %vm952_vm5, %v1075_v15, %v1079_v3  ;;  %v1062_v27 = vrot.slane %v1060_v18, 1 }
 0x120   : > { %v713_v24 = vpop.f32.mrb[31].mxu0  ;;  %v867_v25 = vrot.slane %v865_v13, 7  ;;  %v722_v28 = vadd.f32 %v2911_v19, %v3328_v17  ;;  %v3450_v29 = vsel %vm3365_vm3, 0, %v849_v11  ;;  %v868_v33 = vshll.u32 %v770_v0, 16  ;;  %1173 = vrot.lane.b32.xlu1 %v1080_v26, %s3210_s28 }
 0x121   : > { %v861_v34 = vshll.u32 %v769_v5, 16  ;;  %v711_v35 = vadd.f32 %v3328_v17, %v710_v14  ;;  %v755_v36 = vmax.f32 %v719_v16, 0.0  ;;  %v1063_v38 = vor.u32 %v1062_v27, %v1058_v22 }
 0x122   : > { %v1067_v41 = vrot.slane %v1065_v23, 1  ;;  %v756_v43 = vmax.f32 %v722_v28, 0.0  ;;  %v860_v46 = vrot.slane %v858_v21, 7  ;;  %v714_v49 = vadd.f32 %v3328_v17, %v713_v24 }
 0x123   : > { %v1250_v50 = vrot.slane %v3414_v37, 1  ;;  %v1251_v51 = vrot.slane %v3409_v32, 1  ;;  %v870_v52 = vor.u32 %v868_v33, %v867_v25  ;;  %v1247_v56 = vrot.slane %v3420_v48, 1 }
 0x124   : > { %v1068_v53 = vsel %vm952_vm5, %v1063_v38, %v1067_v41  ;;  %v772_v55 = vpack.c.bf16 %v756_v43, %v755_v36  ;;  %v3461_v57 = vsel %vm3365_vm3, %v867_v25, 0  ;;  %v753_v60 = vmax.f32 %v711_v35, 0.0 }
 0x125   : > { %1171 = vrot.lane.b32.xlu0 %v1068_v53, %s3210_s28  ;;  %v754_v61 = vmax.f32 %v714_v49, 0.0  ;;  %v1252_v17 = vsel %vm1220_vm4, %v1250_v50, %v1251_v51  ;;  %v1248_v32 = vrot.slane %v944_v4, 1  ;;  %v1096_v63 = vshll.u32 %v3443_v20, 16 }
 0x126   : > { %v879_v62 = vshrl.u32 %v772_v55, 16  ;;  %1291 = vrot.lane.b32.xlu1 %v1252_v17, %s3209_s27  ;;  %v1101_v0 = vshll.u32 %v3433_v9, 16  ;;  %v863_v1 = vor.u32 %v861_v34, %v860_v46  ;;  %v1094_v5 = vshrl.u32 %v3443_v20, 16 }
 0x127   : > { %v771_v2 = vpack.c.bf16 %v754_v61, %v753_v60  ;;  %v1084_v6 = vshll.u32 %v3450_v29, 16  ;;  %v1249_v8 = vsel %vm1220_vm4, %v1247_v56, %v1248_v32  ;;  %v1098_v11 = vrot.slane %v1096_v63, 1 }
 0x128   : > { %v881_v7 = vrot.slane %v879_v62, 7  ;;  %v1089_v13 = vshll.u32 %v3437_v12, 16  ;;  %v882_v14 = vshll.u32 %v772_v55, 16  ;;  %v1082_v4 = vshrl.u32 %v3450_v29, 16 }
 0x129   : > { %v872_v15 = vshrl.u32 %v771_v2, 16  ;;  %1289 = vrot.lane.b32.xlu0 %v1249_v8, %s3209_s27  ;;  %v1086_v3 = vrot.slane %v1084_v6, 1  ;;  %v3476_v16 = vsel %vm3365_vm3, 0, %v870_v52  ;;  %v875_v18 = vshll.u32 %v771_v2, 16 }
 0x12a   : > { %v1099_v19 = vor.u32 %v1098_v11, %v1094_v5  ;;  %v1103_v21 = vrot.slane %v1101_v0, 1  ;;  %v884_v22 = vor.u32 %v882_v14, %v881_v7  ;;  %v1091_v25 = vrot.slane %v1089_v13, 1 }
 0x12b   : > { %v874_v23 = vrot.slane %v872_v15, 7  ;;  %v1087_v24 = vor.u32 %v1086_v3, %v1082_v4  ;;  %v3480_v26 = vsel %vm3365_vm3, 0, %v863_v1  ;;  %v948_v27 = vsel %vm3365_vm3, %v860_v46, 0 }
 0x12c   : > { %v1104_v28 = vsel %vm952_vm5, %v1099_v19, %v1103_v21  ;;  %v1256_v33 = vrot.slane %v3443_v20, 1  ;;  %v3488_v34 = vrot.slane %v788_v54, 7  ;;  %v1253_v38 = vrot.slane %v3450_v29, 1 }
 0x12d   : > { %v877_v35 = vor.u32 %v875_v18, %v874_v23  ;;  %1177 = vrot.lane.b32.xlu1 %v1104_v28, %s3210_s28  ;;  %v1092_v36 = vsel %vm952_vm5, %v1087_v24, %v1091_v25  ;;  %v3495_v41 = vsel %vm3365_vm3, %v881_v7, 0  ;;  %v1257_v43 = vrot.slane %v3433_v9, 1 }
 0x12e   : > { %1175 = vrot.lane.b32.xlu0 %v1092_v36, %s3210_s28  ;;  %v1120_v46 = vshll.u32 %v3476_v16, 16  ;;  %v1125_v54 = vshll.u32 %v3461_v57, 16  ;;  %v3503_v49 = vsel %vm3365_vm3, 0, %v884_v22  ;;  %v1254_v50 = vrot.slane %v3437_v12, 1 }
 0x12f   : > { %v1108_v51 = vshll.u32 %v3480_v26, 16  ;;  %v1113_v52 = vshll.u32 %v948_v27, 16  ;;  %v3509_v53 = vsel %vm3365_vm3, 0, %v877_v35  ;;  %v1258_v55 = vsel %vm1220_vm4, %v1256_v33, %v1257_v43 }
 0x130   : > { %v1118_v9 = vshrl.u32 %v3476_v16, 16  ;;  %v1122_v56 = vrot.slane %v1120_v46, 1  ;;  %v3515_v60 = vsel %vm3365_vm3, %v874_v23, 0  ;;  %v1255_v12 = vsel %vm1220_vm4, %v1253_v38, %v1254_v50 }
 0x131   : > { %1295 = vrot.lane.b32.xlu1 %v1258_v55, %s3209_s27  ;;  %v1106_v61 = vshrl.u32 %v3480_v26, 16  ;;  %v1110_v17 = vrot.slane %v1108_v51, 1  ;;  %v1127_v32 = vrot.slane %v1125_v54, 1  ;;  %v1262_v63 = vrot.slane %v3476_v16, 1  ;;  %v3161_v51 = vld [vmem:[%s4342_s3 + $0x8] sm:$0x3f]  }
 0x132   : > { %1293 = vrot.lane.b32.xlu0 %v1255_v12, %s3209_s27  ;;  %v1123_v62 = vor.u32 %v1122_v56, %v1118_v9  ;;  %v1144_v0 = vshll.u32 %v3503_v49, 16  ;;  %v1115_v2 = vrot.slane %v1113_v52, 1  ;;  %v1259_v5 = vrot.slane %v3480_v26, 1  ;;  %3127 = vmatprep.subr.msk.bf16.mxu1 %vm1418_vm6, %v3161_v51 }
 0x133   : > { %v1111_v1 = vor.u32 %v1110_v17, %v1106_v61  ;;  %v1132_v6 = vshll.u32 %v3509_v53, 16  ;;  %v1142_v8 = vshrl.u32 %v3503_v49, 16  ;;  %v1149_v13 = vshll.u32 %v3495_v41, 16  ;;  %3126 = vmatprep.subr.msk.bf16.mxu0 %vm1418_vm6, %v3161_v51 }
 0x134   : > { %v1128_v7 = vsel %vm952_vm5, %v1123_v62, %v1127_v32  ;;  %v1146_v11 = vrot.slane %v1144_v0, 1  ;;  %v1130_v15 = vshrl.u32 %v3509_v53, 16  ;;  %v1137_v3 = vshll.u32 %v3515_v60, 16  ;;  %v3570_v62 = vld [vmem:[%s4342_s3] sm:$0x3f]  }
 0x135   : > { %1181 = vrot.lane.b32.xlu1 %v1128_v7, %s3210_s28  ;;  %v1116_v14 = vsel %vm952_vm5, %v1111_v1, %v1115_v2  ;;  %v1134_v4 = vrot.slane %v1132_v6, 1  ;;  %v784_v18 = vshll.u32 %v3334_v30, 16  ;;  %v1263_v19 = vrot.slane %v3461_v57, 1 }
 0x136   : > { %1179 = vrot.lane.b32.xlu0 %v1116_v14, %s3210_s28  ;;  %v1147_v21 = vor.u32 %v1146_v11, %v1142_v8  ;;  %v791_v22 = vshll.u32 %v3342_v45, 16  ;;  %v1260_v23 = vrot.slane %v948_v27, 1  ;;  %v1151_v33 = vrot.slane %v1149_v13, 1 }
 0x137   : > { %v1135_v24 = vor.u32 %v1134_v4, %v1130_v15  ;;  %v786_v25 = vor.u32 %v784_v18, %v3371_v39  ;;  %v1264_v28 = vsel %vm1220_vm4, %v1262_v63, %v1263_v19  ;;  %v964_v35 = vshll.u32 %v3379_v42, 16 }
 0x138   : > { %v793_v36 = vor.u32 %v791_v22, %v3488_v34  ;;  %v802_v30 = vshrl.u32 %v3350_v59, 16  ;;  %v1261_v57 = vsel %vm1220_vm4, %v1259_v5, %v1260_v23  ;;  %v1139_v38 = vrot.slane %v1137_v3, 1 }
 0x139   : > { %1299 = vrot.lane.b32.xlu1 %v1264_v28, %s3209_s27  ;;  %v795_v45 = vshrl.u32 %v3340_v44, 16  ;;  %v1152_v27 = vsel %vm952_vm5, %v1147_v21, %v1151_v33  ;;  %v936_v43 = vsel %vm3365_vm3, %v3356_v10, 0  ;;  %v1268_v54 = vrot.slane %v3503_v49, 1 }
 0x13a   : > { %1297 = vrot.lane.b32.xlu0 %v1261_v57, %s3209_s27  ;;  %v1140_v46 = vsel %vm952_vm5, %v1135_v24, %v1139_v38  ;;  %v966_v50 = vrot.slane %v964_v35, 1  ;;  %v3556_v52 = vsel %vm3365_vm3, 0, %v786_v25  ;;  %v3560_v55 = vsel %vm3365_vm3, 0, %v793_v36 }
 0x13b   : > { %v804_v9 = vrot.slane %v802_v30, 7  ;;  %v1265_v10 = vrot.slane %v3509_v53, 1  ;;  %v797_v56 = vrot.slane %v795_v45, 7  ;;  %v1269_v12 = vrot.slane %v3495_v41, 1 }
 0x13c   : > { %v962_v61 = vshrl.u32 %v3379_v42, 16  ;;  %v969_v17 = vshll.u32 %v936_v43, 16  ;;  %v798_v32 = vshll.u32 %v3340_v44, 16  ;;  %v805_v63 = vshll.u32 %v3350_v59, 16 }
 0x13d   : > { %1185 = vrot.lane.b32.xlu1 %v1152_v27, %s3210_s28  ;;  %v1266_v0 = vrot.slane %v3515_v60, 1  ;;  %v1270_v1 = vsel %vm1220_vm4, %v1268_v54, %v1269_v12  ;;  %v988_v41 = vshll.u32 %v3560_v55, 16  ;;  %v1420_v5 = vsel %vm1418_vm6, %v3161_v51, 0 }
 0x13e   : > { %1183 = vrot.lane.b32.xlu0 %v1140_v46, %s3210_s28  ;;  %v967_v2 = vor.u32 %v966_v50, %v962_v61  ;;  %v807_v6 = vor.u32 %v805_v63, %v804_v9  ;;  %v976_v59 = vshll.u32 %v3556_v52, 16  ;;  %3061 = vmatpush3.bf16.msra.mxu1 %v1420_v5  ;;  %v800_v60 = vor.u32 %v798_v32, %v797_v56 }
 0x13f   : > { %v1267_v44 = vsel %vm1220_vm4, %v1265_v10, %v1266_v0  ;;  %v809_v7 = vshrl.u32 %v3348_v58, 16  ;;  %v971_v8 = vrot.slane %v969_v17, 1  ;;  %v3211_v11 = vmov 0   ;;  %3128 = vmatprep.subr.msk.bf16.mxu1 %vm1418_vm6, %v3570_v62  ;;  %2913 = vmatpush3.bf16.msra.mxu0 %v1420_v5 }
 0x140   : > { %v958_v13 = vrot.slane %v3211_v11, 1  ;;  %v938_v14 = vsel %vm3365_vm3, %v3488_v34, 0  ;;  %v937_v15 = vsel %vm3365_vm3, %v3371_v39, 0  ;;  %v1223_v3 = vrot.slane %v3379_v42, 1 }
 0x141   : > { %1303 = vrot.lane.b32.xlu1 %v1270_v1, %s3209_s27  ;;  %v972_v4 = vsel %vm952_vm5, %v967_v2, %v971_v8  ;;  %v990_v18 = vrot.slane %v988_v41, 1  ;;  %v3597_v19 = vsel %vm3365_vm3, 0, %v807_v6  ;;  %v1224_v21 = vrot.slane %v936_v43, 1 }
 0x142   : > { %1301 = vrot.lane.b32.xlu0 %v1267_v44, %s3209_s27  ;;  %v978_v22 = vrot.slane %v976_v59, 1  ;;  %v3602_v34 = vsel %vm3365_vm3, 0, %v800_v60  ;;  %v811_v23 = vrot.slane %v809_v7, 7  ;;  %v986_v39 = vshrl.u32 %v3560_v55, 16 }
 0x143   : > { %v993_v24 = vshll.u32 %v938_v14, 16  ;;  %v974_v25 = vshrl.u32 %v3556_v52, 16  ;;  %v981_v28 = vshll.u32 %v937_v15, 16  ;;  %v812_v33 = vshll.u32 %v3348_v58, 16 }
 0x144   : > { %v1225_v35 = vsel %vm1220_vm4, %v1223_v3, %v1224_v21  ;;  %v991_v36 = vor.u32 %v990_v18, %v986_v39  ;;  %v1012_v30 = vshll.u32 %v3597_v19, 16  ;;  %v1000_v38 = vshll.u32 %v3602_v34, 16 }
 0x145   : > { %1155 = vrot.lane.b32.xlu1 %v972_v4, %s3210_s28  ;;  %v979_v57 = vor.u32 %v978_v22, %v974_v25  ;;  %v814_v45 = vor.u32 %v812_v33, %v811_v23  ;;  %v995_v27 = vrot.slane %v993_v24, 1  ;;  %v940_v43 = vsel %vm3365_vm3, %v804_v9, 0 }
 0x146   : > { %1153 = vrot.lane.b32.xlu0 %v958_v13, %s3210_s28  ;;  %v983_v46 = vrot.slane %v981_v28, 1  ;;  %v939_v58 = vsel %vm3365_vm3, %v797_v56, 0  ;;  %v1229_v50 = vrot.slane %v3560_v55, 1  ;;  %v1014_v51 = vrot.slane %v1012_v30, 1 }
 0x147   : > { %v996_v54 = vsel %vm952_vm5, %v991_v36, %v995_v27  ;;  %v1226_v12 = vrot.slane %v3556_v52, 1  ;;  %v1002_v61 = vrot.slane %v1000_v38, 1  ;;  %v3624_v17 = vsel %vm3365_vm3, 0, %v814_v45 }
 0x148   : > { %v984_v10 = vsel %vm952_vm5, %v979_v57, %v983_v46  ;;  %v1230_v9 = vrot.slane %v938_v14, 1  ;;  %v1010_v56 = vshrl.u32 %v3597_v19, 16  ;;  %v1017_v32 = vshll.u32 %v940_v43, 16  ;;  %v3163_v46 = vld [vmem:[%s4342_s3 + $0x10] sm:$0x3f]  }
 0x149   : > { %1273 = vrot.lane.b32.xlu1 %v1225_v35, %s3209_s27  ;;  %v1227_v63 = vrot.slane %v937_v15, 1  ;;  %v998_v0 = vshrl.u32 %v3602_v34, 16  ;;  %v1005_v1 = vshll.u32 %v939_v58, 16  ;;  %v1024_v44 = vshll.u32 %v3624_v17, 16 }
 0x14a   : > { %1271 = vrot.lane.b32.xlu0 %v958_v13, %s3209_s27  ;;  %v1231_v2 = vsel %vm1220_vm4, %v1229_v50, %v1230_v9  ;;  %v1015_v41 = vor.u32 %v1014_v51, %v1010_v56  ;;  %v1019_v59 = vrot.slane %v1017_v32, 1  ;;  %v1235_v8 = vrot.slane %v3597_v19, 1 }
 0x14b   : > { %v1228_v5 = vsel %vm1220_vm4, %v1226_v12, %v1227_v63  ;;  %v1003_v6 = vor.u32 %v1002_v61, %v998_v0  ;;  %v1007_v60 = vrot.slane %v1005_v1, 1  ;;  %v941_v11 = vsel %vm3365_vm3, %v811_v23, 0 }
 0x14c   : > { %v1020_v7 = vsel %vm952_vm5, %v1015_v41, %v1019_v59  ;;  %v1232_v14 = vrot.slane %v3602_v34, 1  ;;  %v1026_v15 = vrot.slane %v1024_v44, 1  ;;  %v1236_v4 = vrot.slane %v940_v43, 1 }
 0x14d   : > { %1159 = vrot.lane.b32.xlu1 %v996_v54, %s3210_s28  ;;  %v1008_v13 = vsel %vm952_vm5, %v1003_v6, %v1007_v60  ;;  %v1233_v3 = vrot.slane %v939_v58, 1  ;;  %v1022_v18 = vshrl.u32 %v3624_v17, 16  ;;  %v1029_v21 = vshll.u32 %v941_v11, 16 }
 0x14e   : > { %1157 = vrot.lane.b32.xlu0 %v984_v10, %s3210_s28  ;;  %v1237_v22 = vsel %vm1220_vm4, %v1235_v8, %v1236_v4  ;;  %v1238_v39 = vrot.slane %v3624_v17, 1  ;;  %v1239_v24 = vrot.slane %v941_v11, 1  ;;  %v1591_v43 = vsel %vm1418_vm6, %v3570_v62, 0 }
 0x14f   : > { %v1234_v31 = vsel %vm1220_vm4, %v1232_v14, %v1233_v3  ;;  %v1027_v23 = vor.u32 %v1026_v15, %v1022_v18  ;;  %v1031_v25 = vrot.slane %v1029_v21, 1 }
 0x150   : > { %v1240_v28 = vsel %vm1220_vm4, %v1238_v39, %v1239_v24 }
 0x151   : > { %1277 = vrot.lane.b32.xlu1 %v1231_v2, %s3209_s27  ;;  %v1032_v33 = vsel %vm952_vm5, %v1027_v23, %v1031_v25 }
 0x152   : > { %1275 = vrot.lane.b32.xlu0 %v1228_v5, %s3209_s27 }
 0x155   : > { %1163 = vrot.lane.b32.xlu1 %v1020_v7, %s3210_s28 }
 0x156   : > { %1161 = vrot.lane.b32.xlu0 %v1008_v13, %s3210_s28 }
 0x159   : > { %1281 = vrot.lane.b32.xlu1 %v1237_v22, %s3209_s27  ;;  %v1763_v22 = vsel %vm1418_vm6, %v3163_v46, 0 }
 0x15a   : > { %1279 = vrot.lane.b32.xlu0 %v1234_v31, %s3209_s27 }
 0x15d   : > { %1283 = vrot.lane.b32.xlu1 %v1240_v28, %s3209_s27 }
 0x15e   : > { %1165 = vrot.lane.b32.xlu0 %v1032_v33, %s3210_s28 }
 0x183   : > { %v1286_v35 = vpop.permute.xlu1 %1285 }
 0x187   : > { %v1288_v45 = vpop.permute.xlu1 %1287 }
 0x189   : > { %v1168_v36 = vpop.permute.xlu0 %1167 }
 0x18a   : > { %v1321_v30 = vsel %vm1305_vm7, %v3383_v47, %v1168_v36 }
 0x18b   : > { %v3655_v57 = vsel %vm1340_vm8, %v1321_v30, %v1286_v35 }
 0x18c   : > { %2926 = vmatprep.mubr.msk.bf16.mxu1 %vm1385_vm9, %v3655_v57 }
 0x18d   : > { %v1170_v38 = vpop.permute.xlu0 %1169 }
 0x18e   : > { %v1323_v27 = vsel %vm1305_vm7, %v3375_v40, %v1170_v38 }
 0x18f   : > { %v3667_v47 = vsel %vm1340_vm8, %v1323_v27, %v1288_v45 }
 0x190   : > { %2927 = vmatmul.mubr.msk.bf16.vlgmr.msra.gmra.mrb[0].mxu1 %vm1385_vm9, %v3667_v47 }
 0x191   : > { %2947 = vmatpush3.bf16.msra.mxu1 %v1591_v43 }
 0x192   : > { %v1174_v58 = vpop.permute.xlu1 %1173  ;;  %3129 = vmatprep.subr.msk.bf16.mxu1 %vm1418_vm6, %v3163_v46 }
 0x193   : > { %v1327_v51 = vsel %vm1305_vm7, %v3414_v37, %v1174_v58 }
 0x197   : > { %v1172_v54 = vpop.permute.xlu0 %1171 }
 0x198   : > { %v1292_v50 = vpop.permute.xlu1 %1291  ;;  %v1325_v40 = vsel %vm1305_vm7, %v3420_v48, %v1172_v54 }
 0x199   : > { %v3680_v12 = vsel %vm1340_vm8, %v1327_v51, %v1292_v50 }
 0x19b   : > { %v1290_v62 = vpop.permute.xlu0 %1289 }
 0x19c   : > { %v3677_v10 = vsel %vm1340_vm8, %v1325_v40, %v1290_v62 }
 0x19d   : > { %2930 = vmatprep.mubr.msk.bf16.mxu1 %vm1385_vm9, %v3677_v10 }
 0x19e   : > { %2931 = vmatmul.mubr.msk.bf16.gmra.mrb[4].mxu1 %vm1385_vm9, %v3680_v12 }
 0x19f   : > { %v1178_v61 = vpop.permute.xlu1 %1177 }
 0x1a0   : > { %v1176_v9 = vpop.permute.xlu0 %1175  ;;  %v1331_v37 = vsel %vm1305_vm7, %v3443_v20, %v1178_v61 }
 0x1a1   : > { %v1329_v48 = vsel %vm1305_vm7, %v3450_v29, %v1176_v9 }
 0x1a3   : > { %v1296_v56 = vpop.permute.xlu1 %1295 }
 0x1a4   : > { %v1294_v32 = vpop.permute.xlu0 %1293  ;;  %v3694_v0 = vsel %vm1340_vm8, %v1331_v37, %v1296_v56 }
 0x1a5   : > { %v3691_v63 = vsel %vm1340_vm8, %v1329_v48, %v1294_v32  ;;  %v3818_v32 = vld [vmem:[%s4343_s4] ss:$0 sm:$0xff] }
 0x1a6   : > { %2934 = vmatprep.mubr.msk.bf16.mxu1 %vm1385_vm9, %v3691_v63 }
 0x1a7   : > { %v1182_v1 = vpop.permute.xlu1 %1181  ;;  %2935 = vmatmul.mubr.msk.bf16.gmra.mrb[8].mxu1 %vm1385_vm9, %v3694_v0 }
 0x1a8   : > { %v1180_v2 = vpop.permute.xlu0 %1179  ;;  %v1335_v20 = vsel %vm1305_vm7, %v3476_v16, %v1182_v1 }
 0x1a9   : > { %v1333_v29 = vsel %vm1305_vm7, %v3480_v26, %v1180_v2 }
 0x1ab   : > { %v1300_v41 = vpop.permute.xlu1 %1299 }
 0x1ac   : > { %v1298_v5 = vpop.permute.xlu0 %1297  ;;  %v3708_v44 = vsel %vm1340_vm8, %v1335_v20, %v1300_v41 }
 0x1ad   : > { %v3705_v6 = vsel %vm1340_vm8, %v1333_v29, %v1298_v5 }
 0x1ae   : > { %2938 = vmatprep.mubr.msk.bf16.mxu1 %vm1385_vm9, %v3705_v6 }
 0x1af   : > { %v1186_v59 = vpop.permute.xlu1 %1185  ;;  %2939 = vmatmul.mubr.msk.bf16.gmra.mrb[12].mxu1 %vm1385_vm9, %v3708_v44 }
 0x1b0   : > { %v1184_v60 = vpop.permute.xlu0 %1183  ;;  %v1339_v16 = vsel %vm1305_vm7, %v3503_v49, %v1186_v59 }
 0x1b1   : > { %v1337_v26 = vsel %vm1305_vm7, %v3509_v53, %v1184_v60 }
 0x1b3   : > { %v1304_v7 = vpop.permute.xlu1 %1303 }
 0x1b4   : > { %v1302_v8 = vpop.permute.xlu0 %1301  ;;  %v3722_v13 = vsel %vm1340_vm8, %v1339_v16, %v1304_v7 }
 0x1b5   : > { %v3719_v11 = vsel %vm1340_vm8, %v1337_v26, %v1302_v8 }
 0x1b6   : > { %2942 = vmatprep.mubr.msk.bf16.mxu1 %vm1385_vm9, %v3719_v11 }
 0x1b7   : > { %2943 = vmatmul.mubr.msk.bf16.gmra.mrb[16].mxu1 %vm1385_vm9, %v3722_v13  ;;  %v1156_v14 = vpop.permute.xlu1 %1155 }
 0x1b8   : > { %v1154_v15 = vpop.permute.xlu0 %1153  ;;  %v1309_v53 = vsel %vm1305_vm7, %v3379_v42, %v1156_v14 }
 0x1b9   : > { %v1307_v49 = vsel %vm1305_vm7, 0, %v1154_v15 }
 0x1bb   : > { %v1274_v4 = vpop.permute.xlu1 %1273 }
 0x1bc   : > { %v1344_v3 = vsel %vm1340_vm8, %v1309_v53, %v1274_v4  ;;  %v1272_v18 = vpop.permute.xlu0 %1271 }
 0x1bd   : > { %v3733_v21 = vsel %vm1340_vm8, %v1307_v49, %v1272_v18  ;;  %2914 = vmatprep.mubr.msk.bf16.mxu0 %vm1385_vm9, %v1344_v3 }
 0x1be   : > { %2948 = vmatprep.mubr.msk.bf16.mxu1 %vm1385_vm9, %v3733_v21 }
 0x1bf   : > { %2949 = vmatmul.mubr.msk.bf16.vlgmr.msra.gmra.mrb[20].mxu1 %vm1385_vm9, %v1344_v3  ;;  %v1160_v39 = vpop.permute.xlu1 %1159 }
 0x1c0   : > { %2981 = vmatpush3.bf16.msra.mxu1 %v1763_v22  ;;  %v1158_v42 = vpop.permute.xlu0 %1157  ;;  %v1313_v25 = vsel %vm1305_vm7, %v3560_v55, %v1160_v39 }
 0x1c1   : > { %v1311_v23 = vsel %vm1305_vm7, %v3556_v52, %v1158_v42 }
 0x1c3   : > { %v1278_v31 = vpop.permute.xlu1 %1277 }
 0x1c4   : > { %v1276_v24 = vpop.permute.xlu0 %1275  ;;  %v1348_v33 = vsel %vm1340_vm8, %v1313_v25, %v1278_v31 }
 0x1c5   : > { %v1346_v28 = vsel %vm1340_vm8, %v1311_v23, %v1276_v24 }
 0x1c6   : > { %2915 = vmatmul.mubr.msk.bf16.vlgmr.msra.gmra.mrb[32].mxu0 %vm1385_vm9, %v1346_v28  ;;  %2952 = vmatprep.mubr.msk.bf16.mxu1 %vm1385_vm9, %v1346_v28 }
 0x1c7   : > { %2918 = vmatprep.mubr.msk.bf16.mxu0 %vm1385_vm9, %v1348_v33  ;;  %2953 = vmatmul.mubr.msk.bf16.gmra.mrb[24].mxu1 %vm1385_vm9, %v1348_v33  ;;  %v1164_v35 = vpop.permute.xlu1 %1163 }
 0x1c8   : > { %v1162_v36 = vpop.permute.xlu0 %1161  ;;  %v1317_v55 = vsel %vm1305_vm7, %v3597_v19, %v1164_v35  ;;  %v2045_v19 = vld [vmem:[%s4344_s5] sm:$0x3] }
 0x1c9   : > { %v1315_v52 = vsel %vm1305_vm7, %v3602_v34, %v1162_v36  ;;  %3130 = vmatprep.subr.msk.bf16.mxu0 %vm2101_vm10, %v2045_v19 }
 0x1cb   : > { %v1282_v30 = vpop.permute.xlu1 %1281 }
 0x1cc   : > { %v1280_v38 = vpop.permute.xlu0 %1279  ;;  %v1352_v27 = vsel %vm1340_vm8, %v1317_v55, %v1282_v30 }
 0x1cd   : > { %v1350_v45 = vsel %vm1340_vm8, %v1315_v52, %v1280_v38 }
 0x1ce   : > { %2919 = vmatmul.mubr.msk.bf16.gmra.mrb[36].mxu0 %vm1385_vm9, %v1350_v45  ;;  %2956 = vmatprep.mubr.msk.bf16.mxu1 %vm1385_vm9, %v1350_v45 }
 0x1cf   : > { %2922 = vmatprep.mubr.msk.bf16.mxu0 %vm1385_vm9, %v1352_v27  ;;  %2957 = vmatmul.mubr.msk.bf16.gmra.mrb[28].mxu1 %vm1385_vm9, %v1352_v27  ;;  %v1284_v46 = vpop.permute.xlu1 %1283 }
 0x1d0   : > { %v1166_v43 = vpop.permute.xlu0 %1165 }
 0x1d1   : > { %v1319_v34 = vsel %vm1305_vm7, %v3624_v17, %v1166_v43  ;;  %v2103_v17 = vsel %vm2101_vm10, %v2045_v19, 0 }
 0x1d2   : > { %v1354_v58 = vsel %vm1340_vm8, %v1319_v34, %v1284_v46  ;;  %3015 = vmatpush3.bf16.msra.mxu0 %v2103_v17 }
 0x1d3   : > { %2960 = vmatprep.mubr.msk.bf16.mxu1 %vm1385_vm9, %v1354_v58 }
 0x1d6   : > { %2923 = vmatmul.mubr.msk.bf16.gmra.mrb[40].mxu0 %vm1385_vm9, %v1354_v58 }
 0x1d7   : > { %2961 = vmatmul.mubr.msk.bf16.gmra.mrb[0].mxu1 %vm1385_vm9, %v3655_v57 }
 0x1d8   : > { %2964 = vmatprep.mubr.msk.bf16.mxu1 %vm1385_vm9, %v3667_v47 }
 0x1df   : > { %2965 = vmatmul.mubr.msk.bf16.gmra.mrb[4].mxu1 %vm1385_vm9, %v3677_v10 }
 0x1e0   : > { %2968 = vmatprep.mubr.msk.bf16.mxu1 %vm1385_vm9, %v3680_v12 }
 0x1e7   : > { %2969 = vmatmul.mubr.msk.bf16.gmra.mrb[8].mxu1 %vm1385_vm9, %v3691_v63 }
 0x1e8   : > { %2972 = vmatprep.mubr.msk.bf16.mxu1 %vm1385_vm9, %v3694_v0 }
 0x1ef   : > { %2973 = vmatmul.mubr.msk.bf16.gmra.mrb[12].mxu1 %vm1385_vm9, %v3705_v6 }
 0x1f0   : > { %2976 = vmatprep.mubr.msk.bf16.mxu1 %vm1385_vm9, %v3708_v44 }
 0x1f7   : > { %2977 = vmatmul.mubr.msk.bf16.gmra.mrb[16].mxu1 %vm1385_vm9, %v3719_v11 }
 0x1f8   : > { %2982 = vmatprep.mubr.msk.bf16.mxu1 %vm1385_vm9, %v1346_v28 }
 0x1ff   : > { %2983 = vmatmul.mubr.msk.bf16.vlgmr.msra.gmra.mrb[20].mxu1 %vm1385_vm9, %v1348_v33 }
 0x200   : > { %2986 = vmatprep.mubr.msk.bf16.mxu1 %vm1385_vm9, %v1350_v45 }
 0x207   : > { %2987 = vmatmul.mubr.msk.bf16.gmra.mrb[24].mxu1 %vm1385_vm9, %v1352_v27 }
 0x208   : > { %2990 = vmatprep.mubr.msk.bf16.mxu1 %vm1385_vm9, %v1354_v58 }
 0x20f   : > { %2991 = vmatmul.mubr.msk.bf16.gmra.mrb[28].mxu1 %vm1385_vm9, %v3655_v57 }
 0x210   : > { %2994 = vmatprep.mubr.msk.bf16.mxu1 %vm1385_vm9, %v3667_v47 }
 0x217   : > { %2995 = vmatmul.mubr.msk.bf16.gmra.mrb[0].mxu1 %vm1385_vm9, %v3677_v10 }
 0x218   : > { %2998 = vmatprep.mubr.msk.bf16.mxu1 %vm1385_vm9, %v3680_v12 }
 0x21f   : > { %2999 = vmatmul.mubr.msk.bf16.gmra.mrb[4].mxu1 %vm1385_vm9, %v3691_v63 }
 0x220   : > { %3002 = vmatprep.mubr.msk.bf16.mxu1 %vm1385_vm9, %v3694_v0 }
 0x227   : > { %3003 = vmatmul.mubr.msk.bf16.gmra.mrb[8].mxu1 %vm1385_vm9, %v3705_v6 }
 0x228   : > { %3006 = vmatprep.mubr.msk.bf16.mxu1 %vm1385_vm9, %v3708_v44 }
 0x22f   : > { %3007 = vmatmul.mubr.msk.bf16.gmra.mrb[12].mxu1 %vm1385_vm9, %v3719_v11 }
 0x230   : > { %3010 = vmatprep.mubr.msk.bf16.mxu1 %vm1385_vm9, %v3722_v13 }
 0x237   : > { %3011 = vmatmul.mubr.msk.bf16.gmra.mrb[16].mxu1 %vm1385_vm9, %v3733_v21 }
 0x299   : > { %v2916_v57 = vpop.f32.mrb[32].mxu0 }
 0x29a   : > { %v1456_v47 = vpop.f32.mrb[33].mxu0 }
 0x29b   : > { %v2917_v54 = vpop.f32.mrb[34].mxu0 }
 0x29c   : > { %v1459_v50 = vpop.f32.mrb[35].mxu0 }
 0x2a1   : > { %v2920_v40 = vpop.f32.mrb[36].mxu0 }
 0x2a2   : > { %v1472_v62 = vpop.f32.mrb[37].mxu0 }
 0x2a3   : > { %v2921_v51 = vpop.f32.mrb[38].mxu0 }
 0x2a4   : > { %v1475_v10 = vpop.f32.mrb[39].mxu0 }
 0x2a9   : > { %v2924_v12 = vpop.f32.mrb[40].mxu0 }
 0x2aa   : > { %v1488_v61 = vpop.f32.mrb[41].mxu0 }
 0x2ab   : > { %v2925_v9 = vpop.f32.mrb[42].mxu0 }
 0x2ac   : > { %v1491_v56 = vpop.f32.mrb[43].mxu0 }
 0x2d2   : > { %v2984_v48 = vpop.f32.mrb[20].mxu1 }
 0x2d3   : > { %v3062_v37 = vadd.f32 %v2984_v48, %v2916_v57  ;;  %v1799_v63 = vpop.f32.mrb[21].mxu1 }
 0x2d4   : > { %v3063_v0 = vadd.f32 %v1799_v63, %v1456_v47  ;;  %v2985_v1 = vpop.f32.mrb[22].mxu1 }
 0x2d5   : > { %v1967_v2 = vadd.f32 %v3062_v37, %v3818_v32  ;;  %v3064_v41 = vadd.f32 %v2985_v1, %v2917_v54  ;;  %v1802_v29 = vpop.f32.mrb[23].mxu1 }
 0x2d6   : > { %v1965_v5 = vadd.f32 %v3063_v0, %v3818_v32  ;;  %v3065_v20 = vadd.f32 %v1802_v29, %v1459_v50 }
 0x2d7   : > { %v1968_v6 = vadd.f32 %v3064_v41, %v3818_v32  ;;  %v1999_v59 = vmax.f32 %v1967_v2, 0.0 }
 0x2d8   : > { %v1966_v44 = vadd.f32 %v3065_v20, %v3818_v32  ;;  %v1997_v7 = vmax.f32 %v1965_v5, 0.0 }
 0x2d9   : > { %v2000_v60 = vmax.f32 %v1968_v6, 0.0 }
 0x2da   : > { %v1998_v26 = vmax.f32 %v1966_v44, 0.0  ;;  %v2988_v8 = vpop.f32.mrb[24].mxu1 }
 0x2db   : > { %v2030_v16 = vpack.c.bf16 %v2000_v60, %v1999_v59  ;;  %v3066_v11 = vadd.f32 %v2988_v8, %v2920_v40  ;;  %v1815_v13 = vpop.f32.mrb[25].mxu1 }
 0x2dc   : > { %v2029_v14 = vpack.c.bf16 %v1998_v26, %v1997_v7  ;;  %v3067_v15 = vadd.f32 %v1815_v13, %v1472_v62  ;;  %v2989_v53 = vpop.f32.mrb[26].mxu1 }
 0x2dd   : > { %v1971_v4 = vadd.f32 %v3066_v11, %v3818_v32  ;;  %v3068_v49 = vadd.f32 %v2989_v53, %v2921_v51  ;;  %v1818_v3 = vpop.f32.mrb[27].mxu1 }
 0x2de   : > { %v1969_v18 = vadd.f32 %v3067_v15, %v3818_v32  ;;  %v3069_v21 = vadd.f32 %v1818_v3, %v1475_v10  ;;  %3016 = vmatprep.mubr.msk.bf16.mxu0 %vm1305_vm7, %v2029_v14 }
 0x2df   : > { %v1972_v22 = vadd.f32 %v3068_v49, %v3818_v32  ;;  %3017 = vmatmul.mubr.msk.bf16.vlgmr.msra.gmra.mrb[44].mxu0 %vm1305_vm7, %v2030_v16  ;;  %v2003_v42 = vmax.f32 %v1971_v4, 0.0 }
 0x2e0   : > { %v1970_v39 = vadd.f32 %v3069_v21, %v3818_v32  ;;  %v2001_v23 = vmax.f32 %v1969_v18, 0.0 }
 0x2e1   : > { %v2004_v31 = vmax.f32 %v1972_v22, 0.0 }
 0x2e2   : > { %v2002_v24 = vmax.f32 %v1970_v39, 0.0  ;;  %v2992_v25 = vpop.f32.mrb[28].mxu1 }
 0x2e3   : > { %v2032_v28 = vpack.c.bf16 %v2004_v31, %v2003_v42  ;;  %v3070_v33 = vadd.f32 %v2992_v25, %v2924_v12  ;;  %v1831_v35 = vpop.f32.mrb[29].mxu1 }
 0x2e4   : > { %v2031_v36 = vpack.c.bf16 %v2002_v24, %v2001_v23  ;;  %v3071_v30 = vadd.f32 %v1831_v35, %v1488_v61  ;;  %v2993_v52 = vpop.f32.mrb[30].mxu1 }
 0x2e5   : > { %v1975_v38 = vadd.f32 %v3070_v33, %v3818_v32  ;;  %v3072_v55 = vadd.f32 %v2993_v52, %v2925_v9  ;;  %v1834_v45 = vpop.f32.mrb[31].mxu1 }
 0x2e6   : > { %v1973_v27 = vadd.f32 %v3071_v30, %v3818_v32  ;;  %v3073_v43 = vadd.f32 %v1834_v45, %v1491_v56  ;;  %3020 = vmatprep.mubr.msk.bf16.mxu0 %vm1305_vm7, %v2031_v36 }
 0x2e7   : > { %v1976_v46 = vadd.f32 %v3072_v55, %v3818_v32  ;;  %3021 = vmatmul.mubr.msk.bf16.gmra.mrb[48].mxu0 %vm1305_vm7, %v2032_v28  ;;  %v2007_v58 = vmax.f32 %v1975_v38, 0.0 }
 0x2e8   : > { %v1974_v34 = vadd.f32 %v3073_v43, %v3818_v32  ;;  %v2005_v17 = vmax.f32 %v1973_v27, 0.0 }
 0x2e9   : > { %v2008_v19 = vmax.f32 %v1976_v46, 0.0 }
 0x2ea   : > { %v2006_v57 = vmax.f32 %v1974_v34, 0.0  ;;  %v2996_v47 = vpop.f32.mrb[0].mxu1 }
 0x2eb   : > { %v2034_v54 = vpack.c.bf16 %v2008_v19, %v2007_v58  ;;  %v1979_v50 = vadd.f32 %v2996_v47, %v3818_v32  ;;  %v1847_v40 = vpop.f32.mrb[1].mxu1 }
 0x2ec   : > { %v2033_v62 = vpack.c.bf16 %v2006_v57, %v2005_v17  ;;  %v1977_v51 = vadd.f32 %v3818_v32, %v1847_v40  ;;  %v2997_v10 = vpop.f32.mrb[2].mxu1 }
 0x2ed   : > { %v1980_v12 = vadd.f32 %v2997_v10, %v3818_v32  ;;  %v1850_v61 = vpop.f32.mrb[3].mxu1  ;;  %v2011_v56 = vmax.f32 %v1979_v50, 0.0 }
 0x2ee   : > { %v1978_v9 = vadd.f32 %v3818_v32, %v1850_v61  ;;  %3024 = vmatprep.mubr.msk.bf16.mxu0 %vm1305_vm7, %v2033_v62  ;;  %v2009_v37 = vmax.f32 %v1977_v51, 0.0 }
 0x2ef   : > { %v2012_v48 = vmax.f32 %v1980_v12, 0.0  ;;  %3025 = vmatmul.mubr.msk.bf16.gmra.mrb[52].mxu0 %vm1305_vm7, %v2034_v54 }
 0x2f0   : > { %v2010_v63 = vmax.f32 %v1978_v9, 0.0  ;;  %v3164_v9 = vld [vmem:[%s4346_s7] sm:$0xff]  }
 0x2f1   : > { %v2036_v0 = vpack.c.bf16 %v2012_v48, %v2011_v56  ;;  %v3212_v56 = vmov 0.0  }
 0x2f2   : > { %v2035_v1 = vpack.c.bf16 %v2010_v63, %v2009_v37  ;;  %v3000_v2 = vpop.f32.mrb[4].mxu1  ;;  %3048 = vmatprep.subr.bf16.mxu0 %v3212_v56 }
 0x2f3   : > { %v1983_v41 = vadd.f32 %v3000_v2, %v3818_v32  ;;  %v1863_v29 = vpop.f32.mrb[5].mxu1  ;;  %3049 = vmatpush3.bf16.msra.mxu0 %v3164_v9 }
 0x2f4   : > { %v1981_v5 = vadd.f32 %v3818_v32, %v1863_v29  ;;  %v3001_v20 = vpop.f32.mrb[6].mxu1  ;;  %3028 = vmatprep.mubr.msk.bf16.mxu0 %vm1305_vm7, %v2035_v1  ;;  %3054 = vmatprep.subr.bf16.mxu0 %v3212_v56 }
 0x2f5   : > { %v1984_v6 = vadd.f32 %v3001_v20, %v3818_v32  ;;  %v1866_v44 = vpop.f32.mrb[7].mxu1  ;;  %v2015_v60 = vmax.f32 %v1983_v41, 0.0 }
 0x2f6   : > { %v1982_v59 = vadd.f32 %v3818_v32, %v1866_v44  ;;  %v2013_v26 = vmax.f32 %v1981_v5, 0.0 }
 0x2f7   : > { %v2016_v7 = vmax.f32 %v1984_v6, 0.0  ;;  %3029 = vmatmul.mubr.msk.bf16.gmra.mrb[56].mxu0 %vm1305_vm7, %v2036_v0 }
 0x2f8   : > { %v2014_v8 = vmax.f32 %v1982_v59, 0.0 }
 0x2f9   : > { %v2038_v16 = vpack.c.bf16 %v2016_v7, %v2015_v60 }
 0x2fa   : > { %v2037_v11 = vpack.c.bf16 %v2014_v8, %v2013_v26  ;;  %v3004_v13 = vpop.f32.mrb[8].mxu1 }
 0x2fb   : > { %v1987_v14 = vadd.f32 %v3004_v13, %v3818_v32  ;;  %v1879_v15 = vpop.f32.mrb[9].mxu1 }
 0x2fc   : > { %v1985_v53 = vadd.f32 %v3818_v32, %v1879_v15  ;;  %v3005_v4 = vpop.f32.mrb[10].mxu1  ;;  %3032 = vmatprep.mubr.msk.bf16.mxu0 %vm1305_vm7, %v2037_v11 }
 0x2fd   : > { %v1988_v49 = vadd.f32 %v3005_v4, %v3818_v32  ;;  %v1882_v3 = vpop.f32.mrb[11].mxu1  ;;  %v2019_v21 = vmax.f32 %v1987_v14, 0.0 }
 0x2fe   : > { %v1986_v18 = vadd.f32 %v3818_v32, %v1882_v3  ;;  %v2017_v39 = vmax.f32 %v1985_v53, 0.0 }
 0x2ff   : > { %v2020_v22 = vmax.f32 %v1988_v49, 0.0  ;;  %3033 = vmatmul.mubr.msk.bf16.gmra.mrb[60].mxu0 %vm1305_vm7, %v2038_v16 }
 0x300   : > { %v2018_v42 = vmax.f32 %v1986_v18, 0.0 }
 0x301   : > { %v2040_v31 = vpack.c.bf16 %v2020_v22, %v2019_v21 }
 0x302   : > { %v2039_v23 = vpack.c.bf16 %v2018_v42, %v2017_v39  ;;  %v3008_v24 = vpop.f32.mrb[12].mxu1 }
 0x303   : > { %v1991_v25 = vadd.f32 %v3008_v24, %v3818_v32  ;;  %v1895_v28 = vpop.f32.mrb[13].mxu1 }
 0x304   : > { %v1989_v33 = vadd.f32 %v3818_v32, %v1895_v28  ;;  %v3009_v35 = vpop.f32.mrb[14].mxu1  ;;  %3036 = vmatprep.mubr.msk.bf16.mxu0 %vm1305_vm7, %v2039_v23 }
 0x305   : > { %v1992_v36 = vadd.f32 %v3009_v35, %v3818_v32  ;;  %v1898_v30 = vpop.f32.mrb[15].mxu1  ;;  %v2023_v38 = vmax.f32 %v1991_v25, 0.0 }
 0x306   : > { %v1990_v52 = vadd.f32 %v3818_v32, %v1898_v30  ;;  %v2021_v45 = vmax.f32 %v1989_v33, 0.0 }
 0x307   : > { %v2024_v55 = vmax.f32 %v1992_v36, 0.0  ;;  %3037 = vmatmul.mubr.msk.bf16.gmra.mrb[64].mxu0 %vm1305_vm7, %v2040_v31 }
 0x308   : > { %v2022_v27 = vmax.f32 %v1990_v52, 0.0 }
 0x309   : > { %v2042_v43 = vpack.c.bf16 %v2024_v55, %v2023_v38 }
 0x30a   : > { %v2041_v46 = vpack.c.bf16 %v2022_v27, %v2021_v45  ;;  %v3012_v34 = vpop.f32.mrb[16].mxu1 }
 0x30b   : > { %v1995_v58 = vadd.f32 %v3012_v34, %v3818_v32  ;;  %v1911_v19 = vpop.f32.mrb[17].mxu1 }
 0x30c   : > { %v1993_v17 = vadd.f32 %v3818_v32, %v1911_v19  ;;  %v3013_v57 = vpop.f32.mrb[18].mxu1  ;;  %3040 = vmatprep.mubr.msk.bf16.mxu0 %vm1305_vm7, %v2041_v46 }
 0x30d   : > { %v1996_v47 = vadd.f32 %v3013_v57, %v3818_v32  ;;  %v1914_v54 = vpop.f32.mrb[19].mxu1  ;;  %v2027_v40 = vmax.f32 %v1995_v58, 0.0 }
 0x30e   : > { %v1994_v50 = vadd.f32 %v3818_v32, %v1914_v54  ;;  %v2025_v51 = vmax.f32 %v1993_v17, 0.0  ;;  %v3878_v32 = vld [vmem:[%s4345_s6] ss:$0 sm:$0xff] }
 0x30f   : > { %v2028_v62 = vmax.f32 %v1996_v47, 0.0  ;;  %3041 = vmatmul.mubr.msk.bf16.gmra.mrb[68].mxu0 %vm1305_vm7, %v2042_v43 }
 0x310   : > { %v2026_v10 = vmax.f32 %v1994_v50, 0.0 }
 0x311   : > { %v2044_v12 = vpack.c.bf16 %v2028_v62, %v2027_v40 }
 0x312   : > { %v2043_v61 = vpack.c.bf16 %v2026_v10, %v2025_v51 }
 0x314   : > { %3044 = vmatprep.mubr.msk.bf16.mxu0 %vm1305_vm7, %v2043_v61 }
 0x317   : > { %3045 = vmatmul.mubr.msk.bf16.gmra.mrb[72].mxu0 %vm1305_vm7, %v2044_v12 }
 0x318   : > { %3050 = vmatprep.mubr.msk.bf16.mxu0 %vm3213_vm11, %v3212_v56 }
 0x3b2   : > { %v3018_v48 = vpop.f32.mrb[44].mxu0 }
 0x3b3   : > { %v2139_v37 = vpop.f32.mrb[45].mxu0  ;;  %v3884_v2 = vadd.f32 %v3018_v48, %v3878_v32 }
 0x3b4   : > { %v3881_v63 = vadd.f32 %v3878_v32, %v2139_v37  ;;  %v3019_v0 = vpop.f32.mrb[46].mxu0 }
 0x3b5   : > { %v2142_v1 = vpop.f32.mrb[47].mxu0  ;;  %v3892_v5 = vadd.f32 %v3019_v0, %v3878_v32  ;;  %v2269_v44 = vsel %vm515_vm0, %v3884_v2, 0.0 }
 0x3b6   : > { %v3887_v41 = vadd.f32 %v3878_v32, %v2142_v1  ;;  %v2266_v29 = vsel %vm515_vm0, %v3881_v63, 0.0 }
 0x3b7   : > { %v2271_v26 = vsel %vm515_vm0, %v3892_v5, 0.0 }
 0x3b8   : > { %v2267_v20 = vsel %vm515_vm0, %v3887_v41, 0.0 }
 0x3b9   : > { %v2268_v6 = vadd.f32 %v2267_v20, %v2266_v29 }
 0x3ba   : > { %v3022_v59 = vpop.f32.mrb[48].mxu0 }
 0x3bb   : > { %v2270_v60 = vadd.f32 %v2269_v44, %v2268_v6  ;;  %v2155_v7 = vpop.f32.mrb[49].mxu0  ;;  %v3904_v14 = vadd.f32 %v3022_v59, %v3878_v32 }
 0x3bc   : > { %v3901_v8 = vadd.f32 %v3878_v32, %v2155_v7  ;;  %v3023_v16 = vpop.f32.mrb[50].mxu0 }
 0x3bd   : > { %v2272_v11 = vadd.f32 %v2271_v26, %v2270_v60  ;;  %v2158_v13 = vpop.f32.mrb[51].mxu0  ;;  %v3912_v49 = vadd.f32 %v3023_v16, %v3878_v32  ;;  %v2277_v21 = vsel %vm515_vm0, %v3904_v14, 0.0 }
 0x3be   : > { %v2273_v15 = vsel %vm515_vm0, %v3901_v8, 0.0  ;;  %v3909_v53 = vadd.f32 %v3878_v32, %v2158_v13 }
 0x3bf   : > { %v2274_v4 = vadd.f32 %v2273_v15, %v2272_v11  ;;  %v2279_v31 = vsel %vm515_vm0, %v3912_v49, 0.0 }
 0x3c0   : > { %v2275_v3 = vsel %vm515_vm0, %v3909_v53, 0.0 }
 0x3c1   : > { %v2276_v18 = vadd.f32 %v2275_v3, %v2274_v4 }
 0x3c2   : > { %v3026_v22 = vpop.f32.mrb[52].mxu0 }
 0x3c3   : > { %v2278_v39 = vadd.f32 %v2277_v21, %v2276_v18  ;;  %v2171_v42 = vpop.f32.mrb[53].mxu0  ;;  %v3924_v33 = vadd.f32 %v3026_v22, %v3878_v32 }
 0x3c4   : > { %v3921_v23 = vadd.f32 %v3878_v32, %v2171_v42  ;;  %v3027_v24 = vpop.f32.mrb[54].mxu0 }
 0x3c5   : > { %v2280_v25 = vadd.f32 %v2279_v31, %v2278_v39  ;;  %v2174_v28 = vpop.f32.mrb[55].mxu0  ;;  %v3932_v52 = vadd.f32 %v3027_v24, %v3878_v32  ;;  %v2285_v45 = vsel %vm515_vm0, %v3924_v33, 0.0 }
 0x3c6   : > { %v2281_v35 = vsel %vm515_vm0, %v3921_v23, 0.0  ;;  %v3929_v36 = vadd.f32 %v3878_v32, %v2174_v28 }
 0x3c7   : > { %v2282_v30 = vadd.f32 %v2281_v35, %v2280_v25  ;;  %v2287_v34 = vsel %vm515_vm0, %v3932_v52, 0.0 }
 0x3c8   : > { %v2283_v38 = vsel %vm515_vm0, %v3929_v36, 0.0 }
 0x3c9   : > { %v2284_v55 = vadd.f32 %v2283_v38, %v2282_v30 }
 0x3ca   : > { %v3030_v27 = vpop.f32.mrb[56].mxu0 }
 0x3cb   : > { %v2286_v43 = vadd.f32 %v2285_v45, %v2284_v55  ;;  %v2187_v46 = vpop.f32.mrb[57].mxu0  ;;  %v3944_v47 = vadd.f32 %v3030_v27, %v3878_v32 }
 0x3cc   : > { %v3941_v58 = vadd.f32 %v3878_v32, %v2187_v46  ;;  %v3031_v19 = vpop.f32.mrb[58].mxu0 }
 0x3cd   : > { %v2288_v17 = vadd.f32 %v2287_v34, %v2286_v43  ;;  %v2190_v57 = vpop.f32.mrb[59].mxu0  ;;  %v3952_v62 = vadd.f32 %v3031_v19, %v3878_v32  ;;  %v2293_v12 = vsel %vm515_vm0, %v3944_v47, 0.0 }
 0x3ce   : > { %v2289_v54 = vsel %vm515_vm0, %v3941_v58, 0.0  ;;  %v3949_v50 = vadd.f32 %v3878_v32, %v2190_v57 }
 0x3cf   : > { %v2290_v40 = vadd.f32 %v2289_v54, %v2288_v17  ;;  %v2295_v37 = vsel %vm515_vm0, %v3952_v62, 0.0 }
 0x3d0   : > { %v2291_v51 = vsel %vm515_vm0, %v3949_v50, 0.0 }
 0x3d1   : > { %v2292_v10 = vadd.f32 %v2291_v51, %v2290_v40 }
 0x3d2   : > { %v3034_v61 = vpop.f32.mrb[60].mxu0 }
 0x3d3   : > { %v2294_v9 = vadd.f32 %v2293_v12, %v2292_v10  ;;  %v2203_v48 = vpop.f32.mrb[61].mxu0  ;;  %v3964_v6 = vadd.f32 %v3034_v61, %v3878_v32 }
 0x3d4   : > { %v3961_v0 = vadd.f32 %v3878_v32, %v2203_v48  ;;  %v3035_v1 = vpop.f32.mrb[62].mxu0 }
 0x3d5   : > { %v2296_v29 = vadd.f32 %v2295_v37, %v2294_v9  ;;  %v2206_v20 = vpop.f32.mrb[63].mxu0  ;;  %v3972_v7 = vadd.f32 %v3035_v1, %v3878_v32  ;;  %v2301_v11 = vsel %vm515_vm0, %v3964_v6, 0.0 }
 0x3d6   : > { %v2297_v44 = vsel %vm515_vm0, %v3961_v0, 0.0  ;;  %v3969_v59 = vadd.f32 %v3878_v32, %v2206_v20 }
 0x3d7   : > { %v2298_v60 = vadd.f32 %v2297_v44, %v2296_v29  ;;  %v2303_v3 = vsel %vm515_vm0, %v3972_v7, 0.0 }
 0x3d8   : > { %v2299_v26 = vsel %vm515_vm0, %v3969_v59, 0.0 }
 0x3d9   : > { %v2300_v16 = vadd.f32 %v2299_v26, %v2298_v60 }
 0x3da   : > { %v3038_v13 = vpop.f32.mrb[64].mxu0 }
 0x3db   : > { %v2302_v15 = vadd.f32 %v2301_v11, %v2300_v16  ;;  %v2219_v4 = vpop.f32.mrb[65].mxu0  ;;  %v3984_v42 = vadd.f32 %v3038_v13, %v3878_v32 }
 0x3dc   : > { %v3981_v18 = vadd.f32 %v3878_v32, %v2219_v4  ;;  %v3039_v21 = vpop.f32.mrb[66].mxu0 }
 0x3dd   : > { %v2304_v22 = vadd.f32 %v2303_v3, %v2302_v15  ;;  %v2222_v39 = vpop.f32.mrb[67].mxu0  ;;  %v3992_v28 = vadd.f32 %v3039_v21, %v3878_v32  ;;  %v2309_v38 = vsel %vm515_vm0, %v3984_v42, 0.0 }
 0x3de   : > { %v2305_v31 = vsel %vm515_vm0, %v3981_v18, 0.0  ;;  %v3989_v24 = vadd.f32 %v3878_v32, %v2222_v39 }
 0x3df   : > { %v2306_v25 = vadd.f32 %v2305_v31, %v2304_v22  ;;  %v2311_v43 = vsel %vm515_vm0, %v3992_v28, 0.0 }
 0x3e0   : > { %v2307_v35 = vsel %vm515_vm0, %v3989_v24, 0.0 }
 0x3e1   : > { %v2308_v30 = vadd.f32 %v2307_v35, %v2306_v25 }
 0x3e2   : > { %v3042_v55 = vpop.f32.mrb[68].mxu0 }
 0x3e3   : > { %v2310_v45 = vadd.f32 %v2309_v38, %v2308_v30  ;;  %v2235_v27 = vpop.f32.mrb[69].mxu0  ;;  %v4004_v57 = vadd.f32 %v3042_v55, %v3878_v32 }
 0x3e4   : > { %v4001_v46 = vadd.f32 %v3878_v32, %v2235_v27  ;;  %v3043_v34 = vpop.f32.mrb[70].mxu0 }
 0x3e5   : > { %v2312_v19 = vadd.f32 %v2311_v43, %v2310_v45  ;;  %v2238_v17 = vpop.f32.mrb[71].mxu0  ;;  %v4012_v10 = vadd.f32 %v3043_v34, %v3878_v32  ;;  %v2317_v9 = vsel %vm515_vm0, %v4004_v57, 0.0 }
 0x3e6   : > { %v2313_v54 = vsel %vm515_vm0, %v4001_v46, 0.0  ;;  %v4009_v40 = vadd.f32 %v3878_v32, %v2238_v17  ;;  %v2340_v17 = vld [vmem:[%s4347_s8] sm:$0x1] }
 0x3e7   : > { %v2314_v51 = vadd.f32 %v2313_v54, %v2312_v19  ;;  %v2319_v29 = vsel %vm515_vm0, %v4012_v10, 0.0 }
 0x3e8   : > { %v2315_v12 = vsel %vm515_vm0, %v4009_v40, 0.0 }
 0x3e9   : > { %v2316_v61 = vadd.f32 %v2315_v12, %v2314_v51 }
 0x3ea   : > { %v3046_v48 = vpop.f32.mrb[72].mxu0 }
 0x3eb   : > { %v2318_v37 = vadd.f32 %v2317_v9, %v2316_v61  ;;  %v2251_v1 = vpop.f32.mrb[73].mxu0  ;;  %v4024_v16 = vadd.f32 %v3046_v48, %v3878_v32 }
 0x3ec   : > { %v4021_v20 = vadd.f32 %v3878_v32, %v2251_v1  ;;  %v3047_v44 = vpop.f32.mrb[74].mxu0  ;;  %v2393_v1 = vld [vmem:[%s4349_s10] sm:$0x1] }
 0x3ed   : > { %v2320_v60 = vadd.f32 %v2319_v29, %v2318_v37  ;;  %v2254_v26 = vpop.f32.mrb[75].mxu0  ;;  %v4032_v4 = vadd.f32 %v3047_v44, %v3878_v32  ;;  %v2325_v22 = vsel %vm515_vm0, %v4024_v16, 0.0 }
 0x3ee   : > { %v2321_v11 = vsel %vm515_vm0, %v4021_v20, 0.0  ;;  %v4029_v13 = vadd.f32 %v3878_v32, %v2254_v26  ;;  %v2392_v32 = vld [vmem:[%s4348_s9] sm:$0x3] }
 0x3ef   : > { %v2322_v15 = vadd.f32 %v2321_v11, %v2320_v60  ;;  %v2327_v31 = vsel %vm515_vm0, %v4032_v4, 0.0  ;;  %v2398_v19 = vsel %vm2101_vm10, %v2392_v32, 0  ;;  %v4070_v32 = vld [vmem:[%s3291_s24 + $0x18] sm:$0xff]  }
 0x3f0   : > { %v2323_v3 = vsel %vm515_vm0, %v4029_v13, 0.0 }
 0x3f1   : > { %v2324_v21 = vadd.f32 %v2323_v3, %v2322_v15 }
 0x3f3   : > { %v2326_v39 = vadd.f32 %v2325_v22, %v2324_v21  ;;  %v2446_v21 = vlaneseq }
 0x3f5   : > { %v2328_v25 = vadd.f32 %v2327_v31, %v2326_v39  ;;  %v2447_v22 = vshrl.u32 %v2446_v21, 7  ;;  %v4055_v39 = vld [vmem:[%s3291_s24] sm:$0xff]  }
 0x3f6   : > { %v2482_v31 = vunpack.c.l.bf16 %v4055_v39 }
 0x3f7   : > { %v2329_v35 = vrot.slane %v2328_v25, 4 }
 0x3f9   : > { %v2330_v30 = vadd.f32 %v2329_v35, %v2328_v25  ;;  %v2483_v25 = vunpack.c.h.bf16 %v4055_v39  ;;  %v4060_v35 = vld [vmem:[%s3291_s24 + $0x8] sm:$0xff]  }
 0x3fb   : > { %v2331_v38 = vrot.slane %v2330_v30, 2 }
 0x3fd   : > { %v2332_v55 = vadd.f32 %v2331_v38, %v2330_v30  ;;  %v2484_v30 = vunpack.c.l.bf16 %v4060_v35  ;;  %v2485_v38 = vunpack.c.h.bf16 %v4060_v35 }
 0x3ff   : > { %v2333_v45 = vrot.slane %v2332_v55, 1 }
 0x401   : > { %v2334_v27 = vadd.f32 %v2333_v45, %v2332_v55  ;;  %v4065_v55 = vld [vmem:[%s3291_s24 + $0x10] sm:$0xff]  }
 0x402   : > { %v2486_v45 = vunpack.c.l.bf16 %v4065_v55 }
 0x403   : > { %v2336_v43 = vmul.f32 0.00390625, %v2334_v27 }
 0x405   : > { %v2337_v34 = vpack.c.bf16 %v2336_v43, %v2336_v43 }
 0x407   : > { %3051 = vmatmul.mubr.msk.bf16.vlgmr.msra.gmra.mrb[76].mxu0 %vm515_vm0, %v2337_v34 }
 0x408   : > { %3055 = vmatpush3.bf16.msra.mxu0 %v2398_v19  ;;  %3056 = vmatprep.mubr.msk.bf16.mxu0 %vm3213_vm11, %v3212_v56  ;;  %v4075_v19 = vld [vmem:[%s3291_s24 + $0x20] sm:$0xff]  }
 0x4da   : > { %v2384_v54 = vpop.f32.mrb[76].mxu0 }
 0x4db   : > { %v2385_v51 = vadd.f32 %v2384_v54, %v2340_v17  ;;  %v3052_v12 = vpop.f32.mrb[77].mxu0 }
 0x4dc   : > { %v2387_v61 = vpop.f32.mrb[78].mxu0  ;;  %v4120_v12 = vld [vmem:[%s3291_s24 + $0x68] sm:$0xff]  }
 0x4dd   : > { %v2390_v9 = vmax.f32 %v2385_v51, 0.0  ;;  %v3053_v48 = vpop.f32.mrb[79].mxu0  ;;  %v4080_v51 = vld [vmem:[%s3291_s24 + $0x28] sm:$0xff]   ;;  %v4115_v61 = vld [vmem:[%s3291_s24 + $0x60] sm:$0xff]  }
 0x4de   : > { %v4110_v48 = vld [vmem:[%s3291_s24 + $0x58] sm:$0xff]   ;;  %v4358_v35 = vunpack.c.l.bf16 %v4080_v51 }
 0x4df   : > { %v2391_v37 = vpack.c.bf16 %v2390_v9, %v2390_v9  ;;  %v4085_v9 = vld [vmem:[%s3291_s24 + $0x30] sm:$0xff]  }
 0x4e1   : > { %3057 = vmatmul.mubr.msk.bf16.vlgmr.msra.gmra.mrb[80].mxu0 %vm1305_vm7, %v2391_v37  ;;  %v2448_v37 = vsub.s32 0, %v2447_v22  ;;  %v4105_v22 = vld [vmem:[%s3291_s24 + $0x50] sm:$0xff]  }
 0x5b4   : > { %v2434_v56 = vpop.f32.mrb[80].mxu0 }
 0x5b5   : > { %v2435_v29 = vadd.f32 %v2434_v56, %v2393_v1  ;;  %v3058_v44 = vpop.f32.mrb[81].mxu0  ;;  %v4090_v56 = vld [vmem:[%s3291_s24 + $0x38] sm:$0xff]   ;;  %v4125_v1 = vld [vmem:[%s3291_s24 + $0x70] sm:$0xff]  }
 0x5b6   : > { %v2437_v60 = vpop.f32.mrb[82].mxu0 }
 0x5b7   : > { %v2784_v26 = vmul.f32 -1.442695, %v2435_v29  ;;  %v3059_v11 = vpop.f32.mrb[83].mxu0  ;;  %v4095_v60 = vld [vmem:[%s3291_s24 + $0x40] sm:$0xff]  }
 0x5b8   : > { %v4130_v11 = vld [vmem:[%s3291_s24 + $0x78] sm:$0xff]  }
 0x5b9   : > { %3181 = vpow2.f32 %v2784_v26 }
 0x5c3   : > { %v3182_v15 = vpop.eup %3181 }
 0x5c4   : > { %v2443_v3 = vadd.f32 1.0, %v3182_v15  ;;  %v4100_v15 = vld [vmem:[%s3291_s24 + $0x48] sm:$0xff]   ;;  %s2788_s24 = sshll.u32 %s4381_s18, 8 }
 0x5c5   : > { %s4242_s15 = scalar_lea.vmem %s4350_s11, %s2788_s24 }
 0x5c6   : > { %3183 = vrcp.f32 %v2443_v3 }
 0x5d0   : > { %v3184_v44 = vpop.eup %3183 }
 0x5d1   : > { %v2449_v17 = vrot.slane %v3184_v44, %v2448_v37 }
 0x5d3   : > { %v2450_v21 = vmul.f32 %v2449_v17, %v3881_v63  ;;  %v2451_v27 = vmul.f32 %v2449_v17, %v3887_v41  ;;  %v2452_v29 = vmul.f32 %v2449_v17, %v3884_v2  ;;  %v2453_v37 = vmul.f32 %v2449_v17, %v3892_v5 }
 0x5d4   : > { %v2454_v44 = vmul.f32 %v2449_v17, %v3901_v8  ;;  %v2455_v34 = vmul.f32 %v2449_v17, %v3909_v53  ;;  %v2456_v26 = vmul.f32 %v2449_v17, %v3904_v14  ;;  %v2457_v54 = vmul.f32 %v2449_v17, %v3912_v49 }
 0x5d5   : > { %v2458_v43 = vmul.f32 %v2449_v17, %v3921_v23  ;;  %v2459_v3 = vmul.f32 %v2449_v17, %v3929_v36  ;;  %v2460_v63 = vmul.f32 %v2449_v17, %v3924_v33  ;;  %v2461_v41 = vmul.f32 %v2449_v17, %v3932_v52 }
 0x5d6   : > { %v2462_v2 = vmul.f32 %v2449_v17, %v3941_v58  ;;  %v2463_v5 = vmul.f32 %v2449_v17, %v3949_v50  ;;  %v2464_v8 = vmul.f32 %v2449_v17, %v3944_v47  ;;  %v2465_v53 = vmul.f32 %v2449_v17, %v3952_v62 }
 0x5d7   : > { %v2466_v14 = vmul.f32 %v2449_v17, %v3961_v0  ;;  %v2467_v49 = vmul.f32 %v2449_v17, %v3969_v59  ;;  %v2468_v23 = vmul.f32 %v2449_v17, %v3964_v6  ;;  %v2469_v36 = vmul.f32 %v2449_v17, %v3972_v7 }
 0x5d8   : > { %v2470_v33 = vmul.f32 %v2449_v17, %v3981_v18  ;;  %v2471_v52 = vmul.f32 %v2449_v17, %v3989_v24  ;;  %v2472_v58 = vmul.f32 %v2449_v17, %v3984_v42  ;;  %v2473_v50 = vmul.f32 %v2449_v17, %v3992_v28 }
 0x5d9   : > { %v2474_v47 = vmul.f32 %v2449_v17, %v4001_v46  ;;  %v2475_v62 = vmul.f32 %v2449_v17, %v4009_v40  ;;  %v2476_v0 = vmul.f32 %v2449_v17, %v4004_v57  ;;  %v2477_v59 = vmul.f32 %v2449_v17, %v4012_v10 }
 0x5da   : > { %v2478_v6 = vmul.f32 %v2449_v17, %v4021_v20  ;;  %v2479_v7 = vmul.f32 %v2449_v17, %v4029_v13  ;;  %v2480_v18 = vmul.f32 %v2449_v17, %v4024_v16  ;;  %v2481_v24 = vmul.f32 %v2449_v17, %v4032_v4 }
 0x5db   : > { %v2514_v42 = vadd.f32 %v2482_v31, %v2450_v21  ;;  %v2515_v28 = vadd.f32 %v2483_v25, %v2451_v27  ;;  %v2516_v46 = vadd.f32 %v2484_v30, %v2452_v29  ;;  %v2517_v57 = vadd.f32 %v2485_v38, %v2453_v37 }
 0x5dc   : > { %v2518_v40 = vadd.f32 %v2486_v45, %v2454_v44  ;;  %v4353_v10 = vunpack.c.h.bf16 %v4065_v55  ;;  %v4354_v16 = vunpack.c.l.bf16 %v4070_v32  ;;  %v4355_v4 = vunpack.c.h.bf16 %v4070_v32 }
 0x5dd   : > { %v4356_v31 = vunpack.c.l.bf16 %v4075_v19  ;;  %v4357_v30 = vunpack.c.h.bf16 %v4075_v19  ;;  %v2524_v38 = vadd.f32 %v4358_v35, %v2460_v63  ;;  %v4359_v45 = vunpack.c.h.bf16 %v4080_v51 }
 0x5de   : > { %v2519_v20 = vadd.f32 %v4353_v10, %v2455_v34  ;;  %v2520_v13 = vadd.f32 %v4354_v16, %v2456_v26  ;;  %v2521_v39 = vadd.f32 %v4355_v4, %v2457_v54  ;;  %v4360_v55 = vunpack.c.l.bf16 %v4085_v9 }
 0x5df   : > { %v2522_v25 = vadd.f32 %v4356_v31, %v2458_v43  ;;  %v2523_v27 = vadd.f32 %v4357_v30, %v2459_v3  ;;  %v2525_v17 = vadd.f32 %v4359_v45, %v2461_v41  ;;  %v4361_v29 = vunpack.c.h.bf16 %v4085_v9 }
 0x5e0   : > { %v2526_v34 = vadd.f32 %v4360_v55, %v2462_v2  ;;  %v4362_v32 = vunpack.c.l.bf16 %v4090_v56  ;;  %v4363_v43 = vunpack.c.h.bf16 %v4090_v56  ;;  %v4364_v19 = vunpack.c.l.bf16 %v4095_v60 }
 0x5e1   : > { %v2527_v26 = vadd.f32 %v4361_v29, %v2463_v5  ;;  %v4365_v37 = vunpack.c.h.bf16 %v4095_v60  ;;  %v4366_v44 = vunpack.c.l.bf16 %v4100_v15  ;;  %v4367_v41 = vunpack.c.h.bf16 %v4100_v15 }
 0x5e2   : > { %v2528_v54 = vadd.f32 %v4362_v32, %v2464_v8  ;;  %v2529_v21 = vadd.f32 %v4363_v43, %v2465_v53  ;;  %v2530_v3 = vadd.f32 %v4364_v19, %v2466_v14  ;;  %v4368_v2 = vunpack.c.l.bf16 %v4105_v22 }
 0x5e3   : > { %v2531_v51 = vadd.f32 %v4365_v37, %v2467_v49  ;;  %v2532_v63 = vadd.f32 %v4366_v44, %v2468_v23  ;;  %v2533_v9 = vadd.f32 %v4367_v41, %v2469_v36  ;;  %v4369_v56 = vunpack.c.h.bf16 %v4105_v22 }
 0x5e4   : > { %v4209_v5 = vadd.f32 %v4368_v2, %v2470_v33  ;;  %v4370_v53 = vunpack.c.l.bf16 %v4110_v48  ;;  %v4371_v60 = vunpack.c.h.bf16 %v4110_v48  ;;  %v4372_v23 = vunpack.c.l.bf16 %v4115_v61 }
 0x5e5   : > { %v4213_v8 = vadd.f32 %v4369_v56, %v2471_v52  ;;  %v4373_v36 = vunpack.c.h.bf16 %v4115_v61  ;;  %v4374_v22 = vunpack.c.l.bf16 %v4120_v12  ;;  %v4375_v10 = vunpack.c.h.bf16 %v4120_v12 }
 0x5e6   : > { %v4217_v14 = vadd.f32 %v4370_v53, %v2472_v58  ;;  %v4221_v49 = vadd.f32 %v4371_v60, %v2473_v50  ;;  %v4225_v15 = vadd.f32 %v4372_v23, %v2474_v47  ;;  %v4376_v48 = vunpack.c.l.bf16 %v4125_v1 }
 0x5e7   : > { %v4229_v33 = vadd.f32 %v4373_v36, %v2475_v62  ;;  %v4233_v52 = vadd.f32 %v4374_v22, %v2476_v0  ;;  %v4237_v58 = vadd.f32 %v4375_v10, %v2477_v59  ;;  %v4377_v61 = vunpack.c.h.bf16 %v4125_v1 }
 0x5e8   : > { %v4246_v50 = vadd.f32 %v4376_v48, %v2478_v6  ;;  %v4378_v62 = vunpack.c.l.bf16 %v4130_v11  ;;  %v4379_v0 = vunpack.c.h.bf16 %v4130_v11  ;;  %v2546_v16 = vmax.f32 %v2514_v42, 0.0 }
 0x5e9   : > { %v4250_v47 = vadd.f32 %v4377_v61, %v2479_v7  ;;  %v2547_v4 = vmax.f32 %v2515_v28, 0.0  ;;  %v2548_v6 = vmax.f32 %v2516_v46, 0.0  ;;  %v2549_v31 = vmax.f32 %v2517_v57, 0.0 }
 0x5ea   : > { %v4254_v12 = vadd.f32 %v4378_v62, %v2480_v18  ;;  %v4258_v59 = vadd.f32 %v4379_v0, %v2481_v24  ;;  %v2550_v30 = vmax.f32 %v2518_v40, 0.0  ;;  %v2551_v1 = vmax.f32 %v2519_v20, 0.0  ;;  %2578 = vst.msk [vmem:[%s4242_s15] sm:$0xff] %vm515_vm0, %v2546_v16 }
 0x5eb   : > { %v2552_v7 = vmax.f32 %v2520_v13, 0.0  ;;  %v2553_v35 = vmax.f32 %v2521_v39, 0.0  ;;  %v2554_v18 = vmax.f32 %v2522_v25, 0.0  ;;  %v2555_v45 = vmax.f32 %v2523_v27, 0.0  ;;  %2579 = vst.msk [vmem:[%s4242_s15 + $0x8] sm:$0xff] %vm515_vm0, %v2547_v4  ;;  %2580 = vst.msk [vmem:[%s4242_s15 + $0x10] sm:$0xff] %vm515_vm0, %v2548_v6 }
 0x5ec   : > { %v2556_v55 = vmax.f32 %v2524_v38, 0.0  ;;  %v2557_v11 = vmax.f32 %v2525_v17, 0.0  ;;  %2581 = vst.msk [vmem:[%s4242_s15 + $0x18] sm:$0xff] %vm515_vm0, %v2549_v31  ;;  %v2558_v24 = vmax.f32 %v2526_v34, 0.0  ;;  %v2559_v42 = vmax.f32 %v2527_v26, 0.0  ;;  %2582 = vst.msk [vmem:[%s4242_s15 + $0x20] sm:$0xff] %vm515_vm0, %v2550_v30 }
 0x5ed   : > { %v2560_v28 = vmax.f32 %v2528_v54, 0.0  ;;  %v2561_v46 = vmax.f32 %v2529_v21, 0.0  ;;  %2583 = vst.msk [vmem:[%s4242_s15 + $0x28] sm:$0xff] %vm515_vm0, %v2551_v1  ;;  %2584 = vst.msk [vmem:[%s4242_s15 + $0x30] sm:$0xff] %vm515_vm0, %v2552_v7  ;;  %v2562_v57 = vmax.f32 %v2530_v3, 0.0  ;;  %v2563_v40 = vmax.f32 %v2531_v51, 0.0 }
 0x5ee   : > { %2585 = vst.msk [vmem:[%s4242_s15 + $0x38] sm:$0xff] %vm515_vm0, %v2553_v35  ;;  %v2564_v20 = vmax.f32 %v2532_v63, 0.0  ;;  %v2565_v13 = vmax.f32 %v2533_v9, 0.0  ;;  %2586 = vst.msk [vmem:[%s4242_s15 + $0x40] sm:$0xff] %vm515_vm0, %v2554_v18  ;;  %v2566_v39 = vmax.f32 %v4209_v5, 0.0  ;;  %v2567_v25 = vmax.f32 %v4213_v8, 0.0 }
 0x5ef   : > { %2587 = vst.msk [vmem:[%s4242_s15 + $0x48] sm:$0xff] %vm515_vm0, %v2555_v45  ;;  %2588 = vst.msk [vmem:[%s4242_s15 + $0x50] sm:$0xff] %vm515_vm0, %v2556_v55  ;;  %v2568_v27 = vmax.f32 %v4217_v14, 0.0  ;;  %v2569_v38 = vmax.f32 %v4221_v49, 0.0  ;;  %v2570_v17 = vmax.f32 %v4225_v15, 0.0  ;;  %v2571_v34 = vmax.f32 %v4229_v33, 0.0 }
 0x5f0   : > { %2589 = vst.msk [vmem:[%s4242_s15 + $0x58] sm:$0xff] %vm515_vm0, %v2557_v11  ;;  %2590 = vst.msk [vmem:[%s4242_s15 + $0x60] sm:$0xff] %vm515_vm0, %v2558_v24  ;;  %v2572_v29 = vmax.f32 %v4233_v52, 0.0  ;;  %v2573_v26 = vmax.f32 %v4237_v58, 0.0  ;;  %v2574_v32 = vmax.f32 %v4246_v50, 0.0  ;;  %v2575_v54 = vmax.f32 %v4250_v47, 0.0 }
 0x5f1   : > { %2591 = vst.msk [vmem:[%s4242_s15 + $0x68] sm:$0xff] %vm515_vm0, %v2559_v42  ;;  %2592 = vst.msk [vmem:[%s4242_s15 + $0x70] sm:$0xff] %vm515_vm0, %v2560_v28  ;;  %v2576_v43 = vmax.f32 %v4254_v12, 0.0  ;;  %v2577_v21 = vmax.f32 %v4258_v59, 0.0 }
 0x5f2   : > { %2593 = vst.msk [vmem:[%s4242_s15 + $0x78] sm:$0xff] %vm515_vm0, %v2561_v46  ;;  %2594 = vst.msk [vmem:[%s4242_s15 + $0x80] sm:$0xff] %vm515_vm0, %v2562_v57 }
 0x5f3   : > { %2595 = vst.msk [vmem:[%s4242_s15 + $0x88] sm:$0xff] %vm515_vm0, %v2563_v40  ;;  %2596 = vst.msk [vmem:[%s4242_s15 + $0x90] sm:$0xff] %vm515_vm0, %v2564_v20 }
 0x5f4   : > { %2597 = vst.msk [vmem:[%s4242_s15 + $0x98] sm:$0xff] %vm515_vm0, %v2565_v13  ;;  %2598 = vst.msk [vmem:[%s4242_s15 + $0xa0] sm:$0xff] %vm515_vm0, %v2566_v39 }
 0x5f5   : > { %2599 = vst.msk [vmem:[%s4242_s15 + $0xa8] sm:$0xff] %vm515_vm0, %v2567_v25  ;;  %2600 = vst.msk [vmem:[%s4242_s15 + $0xb0] sm:$0xff] %vm515_vm0, %v2568_v27 }
 0x5f6   : > { %2601 = vst.msk [vmem:[%s4242_s15 + $0xb8] sm:$0xff] %vm515_vm0, %v2569_v38  ;;  %2602 = vst.msk [vmem:[%s4242_s15 + $0xc0] sm:$0xff] %vm515_vm0, %v2570_v17 }
 0x5f7   : > { %2603 = vst.msk [vmem:[%s4242_s15 + $0xc8] sm:$0xff] %vm515_vm0, %v2571_v34  ;;  %2604 = vst.msk [vmem:[%s4242_s15 + $0xd0] sm:$0xff] %vm515_vm0, %v2572_v29 }
 0x5f8   : > { %2605 = vst.msk [vmem:[%s4242_s15 + $0xd8] sm:$0xff] %vm515_vm0, %v2573_v26  ;;  %2606 = vst.msk [vmem:[%s4242_s15 + $0xe0] sm:$0xff] %vm515_vm0, %v2574_v32 }
 0x5f9   : > { %2607 = vst.msk [vmem:[%s4242_s15 + $0xe8] sm:$0xff] %vm515_vm0, %v2575_v54  ;;  %2608 = vst.msk [vmem:[%s4242_s15 + $0xf0] sm:$0xff] %vm515_vm0, %v2576_v43 }
 0x5fa   : > { %2609 = vst.msk [vmem:[%s4242_s15 + $0xf8] sm:$0xff] %vm515_vm0, %v2577_v21 }
 0x5fb PF: > { %s21_s17 = sadd.s32 1, %s3207_s17  }
 0x5fc   : > { %p18_p4 = scmp.ge.s32.totalorder %s21_s17, 4  }
 0x5fe   :  { %20 = sbr.rel (!%p18_p4) target bundleno = 1 (0x1), region = 96 }

</bundles_post_ra>
